<compile_context>
chip_gen: v7x
topology: tpu7x:2x2x1
jax: 0.10.0
libtpu: 0.0.40
codegen_flags: <defaults>
</compile_context>

<pallas_src>
import jax
import jax.numpy as jnp
from jax.experimental import pallas as pl
from jax.experimental.pallas import tpu as pltpu

EPS = 1e-5
BF16 = jnp.bfloat16


# ---------------------------------------------------------------------------
# In-kernel helpers (bf16 matmuls, f32 accumulation)
# ---------------------------------------------------------------------------
def _dot(a, b):
    """bf16 x bf16 matmul with f32 accumulation (weights already bf16)."""
    return jnp.dot(a.astype(BF16), b, preferred_element_type=jnp.float32)


def _mlp3(x, w1, b1, w2, b2, w3, b3):
    """Three pointwise conv layers (BN folded) with relu. Returns (TN, 1024) f32."""
    h = jnp.maximum(_dot(x, w1) + b1, 0.0)
    h = jnp.maximum(_dot(h, w2) + b2, 0.0)
    return jnp.maximum(_dot(h, w3) + b3, 0.0)


def _running_max(out_ref, chunk_max):
    """Online max over the point-chunk grid axis; output block stays resident."""
    n = pl.program_id(1)

    @pl.when(n == 0)
    def _():
        out_ref[0] = chunk_max

    @pl.when(n > 0)
    def _():
        out_ref[0] = jnp.maximum(out_ref[0], chunk_max)


# ---------------------------------------------------------------------------
# Kernels
# ---------------------------------------------------------------------------
def stn_points_kernel(x_ref, w1, b1, w2, b2, w3, b3, g_ref):
    """STN3d point-MLP + max-pool over points (chunked)."""
    h = _mlp3(x_ref[0], w1[...], b1[...], w2[...], b2[...], w3[...], b3[...])
    _running_max(g_ref, jnp.max(h, axis=0, keepdims=True))


def fc_head_kernel(g_ref, w1, b1, w2, b2, w3, b3, out_ref):
    """Batched FC head: fc1(+relu) fc2(+relu) fc3 (identity folded into b3)."""
    h = jnp.maximum(_dot(g_ref[...], w1[...]) + b1[...], 0.0)
    h = jnp.maximum(_dot(h, w2[...]) + b2[...], 0.0)
    out_ref[...] = _dot(h, w3[...]) + b3[...]


def feat_points_kernel(x_ref, mw1_ref, c1b,
                       f_w1, f_b1, f_w2, f_b2, f_w3, f_b3, gf_ref):
    """Merged (trans-folded) conv1(+relu) + STNkd point-MLP + max (chunked)."""
    h1 = jnp.maximum(_dot(x_ref[0], mw1_ref[0]) + c1b[...], 0.0)       # (TN, 64)
    h = _mlp3(h1, f_w1[...], f_b1[...], f_w2[...], f_b2[...], f_w3[...], f_b3[...])
    _running_max(gf_ref, jnp.max(h, axis=0, keepdims=True))


def tail_kernel(x_ref, mw1_ref, c1b, mc2_ref, c2b, c3w, c3b, out_ref):
    """Merged conv1(+relu), merged conv2(+relu) (tfeat folded), conv3, max."""
    h1 = jnp.maximum(_dot(x_ref[0], mw1_ref[0]) + c1b[...], 0.0)       # (TN, 64)
    h = jnp.maximum(_dot(h1, mc2_ref[0]) + c2b[...], 0.0)              # (TN, 128)
    h = _dot(h, c3w[...]) + c3b[...]                                   # (TN, 256) no relu
    _running_max(out_ref, jnp.max(h, axis=0, keepdims=True))


# ---------------------------------------------------------------------------
# Wrapper helpers
# ---------------------------------------------------------------------------
def _choose_tile(n):
    """Pick a point-tile size TN and padded point count N_pad (multiple of TN).

    Prefers large tiles (amortizes the ~0.35us per-grid-step cost) but caps at
    2048 so the (TN, 1024) f32 intermediate stays small vs v7x's 64 MiB VMEM.
    Non-divisible N is padded (wrapper pads with replicated points, which
    cannot change a max-pool).
    """
    candidates = (2048, 1024, 512, 256, 128)
    for t in candidates:
        if n % t == 0:
            return t, n
    if n < 128:
        t = -(-n // 8) * 8
        return t, t
    for t in candidates:                         # largest tile with <=12.5% padding
        n_pad = -(-n // t) * t
        if (n_pad - n) * 8 <= n_pad:
            return t, n_pad
    n_pad = -(-n // 128) * 128
    return 128, n_pad


def _const_spec(w, grid_rank):
    """Full-array block, constant index map, single-buffered (resident weight)."""
    nd = w.ndim
    if grid_rank == 1:
        imap = lambda i, _nd=nd: (0,) * _nd
    else:
        imap = lambda b, n, _nd=nd: (0,) * _nd
    return pl.BlockSpec(w.shape, imap, pipeline_mode=pl.Buffered(1))


def _const_specs(ws, grid_rank):
    return [_const_spec(w, grid_rank) for w in ws]


def _fold_conv1(t9, c1_w, B, D):
    """Fold the flattened 3x3 STN transform into conv1 -> (B, D, 64) bf16."""
    t3 = t9.reshape(B, 3, 3)
    mw = jnp.einsum("bij,jk->bik", t3, c1_w[:3].astype(jnp.float32))   # (B, 3, 64)
    if D > 3:
        extra = jnp.broadcast_to(c1_w[3:].astype(jnp.float32)[None], (B, D - 3, 64))
        mw = jnp.concatenate([mw, extra], axis=1)                      # (B, D, 64)
    return mw.astype(BF16)


def _fold_conv2(tf_flat, c2_w, B):
    """Fold the 64x64 feature transform into conv2 -> (B, 64, 128) bf16."""
    tfeat = tf_flat.reshape(B, 64, 64).astype(BF16)
    mc2 = jnp.einsum("bij,jk->bik", tfeat, c2_w,
                     preferred_element_type=jnp.float32)               # (B, 64, 128)
    return mc2.astype(BF16)


# ---------------------------------------------------------------------------
# Forward
# ---------------------------------------------------------------------------
def pointnet_encoder_forward(x, params):
    """x: (B, N, C) float32  ->  (B, 256) float32."""
    B, N, D = x.shape
    has_extra = D > 3

    TN, N_pad = _choose_tile(N)
    if N_pad != N:
        # pad by replicating the first point: max-pool is duplicate-invariant
        pad = jnp.broadcast_to(x[:, :1, :], (B, N_pad - N, D))
        x = jnp.concatenate([x, pad], axis=1)
    NT = N_pad // TN
    grid = (B, NT)

    stn_pts = params["stn_pts"]
    stn_head = params["stn_head"]
    c1_w, c1_b = params["conv1"]
    fstn_pts = params["fstn_pts"]
    fstn_head = params["fstn_head"]
    c2_w, c2_b, c3_w, c3_b = params["conv23"]

    x_spec = pl.BlockSpec((1, TN, D), lambda b, n: (b, n, 0))
    mw1_spec = pl.BlockSpec((1, D, 64), lambda b, n: (b, 0, 0))
    mc2_spec = pl.BlockSpec((1, 64, 128), lambda b, n: (b, 0, 0))

    def vec_out(c):
        return pl.BlockSpec((1, 1, c), lambda b, n: (b, 0, 0))

    # vmem budget scales with TN; capped well under v7x's 64 MiB per-TC VMEM
    vmem_bytes = int(min(48 * 1024 * 1024, max(24 * 1024 * 1024, 5 * TN * 1024 * 4)))
    cp_grid = pltpu.CompilerParams(
        dimension_semantics=("parallel", "arbitrary"),
        vmem_limit_bytes=vmem_bytes)
    cp_one = pltpu.CompilerParams(
        dimension_semantics=("arbitrary",),
        vmem_limit_bytes=16 * 1024 * 1024)

    # --- 1. STN3d point-MLP + max over points -> g (B, 1, 1024) ---
    g = pl.pallas_call(
        stn_points_kernel,
        grid=grid,
        in_specs=[x_spec] + _const_specs(stn_pts, 2),
        out_specs=vec_out(1024),
        out_shape=jax.ShapeDtypeStruct((B, 1, 1024), jnp.float32),
        compiler_params=cp_grid,
    )(x, *stn_pts)

    # --- 2. STN3d FC head, batched over B -> flat 3x3 transform (B, 9) ---
    t9 = pl.pallas_call(
        fc_head_kernel,
        grid=(1,),
        in_specs=[pl.BlockSpec((B, 1024), lambda i: (0, 0))]
                 + _const_specs(stn_head, 1),
        out_specs=pl.BlockSpec((B, 9), lambda i: (0, 0)),
        out_shape=jax.ShapeDtypeStruct((B, 9), jnp.float32),
        compiler_params=cp_one,
    )(g.reshape(B, 1024), *stn_head)

    # --- 3. fold 3x3 transform into conv1 (tiny XLA glue) -> (B, D, 64) bf16 ---
    mw1 = _fold_conv1(t9, c1_w, B, D)

    # --- 4. merged conv1 + STNkd point-MLP + max -> gf (B, 1, 1024) ---
    gf = pl.pallas_call(
        feat_points_kernel,
        grid=grid,
        in_specs=[x_spec, mw1_spec] + _const_specs((c1_b,) + fstn_pts, 2),
        out_specs=vec_out(1024),
        out_shape=jax.ShapeDtypeStruct((B, 1, 1024), jnp.float32),
        compiler_params=cp_grid,
    )(x, mw1, c1_b, *fstn_pts)

    # --- 5. STNkd FC head, batched over B -> flat 64x64 transform (B, 4096) ---
    tf_flat = pl.pallas_call(
        fc_head_kernel,
        grid=(1,),
        in_specs=[pl.BlockSpec((B, 1024), lambda i: (0, 0))]
                 + _const_specs(fstn_head, 1),
        out_specs=pl.BlockSpec((B, 64 * 64), lambda i: (0, 0)),
        out_shape=jax.ShapeDtypeStruct((B, 64 * 64), jnp.float32),
        compiler_params=cp_one,
    )(gf.reshape(B, 1024), *fstn_head)

    # --- 6. fold 64x64 feature transform into conv2 -> (B, 64, 128) bf16 ---
    mc2 = _fold_conv2(tf_flat, c2_w, B)

    # --- 7. merged conv1, merged conv2(+relu), conv3, max -> (B, 256) ---
    out = pl.pallas_call(
        tail_kernel,
        grid=grid,
        in_specs=[x_spec, mw1_spec, _const_spec(c1_b, 2), mc2_spec,
                  _const_spec(c2_b, 2), _const_spec(c3_w, 2), _const_spec(c3_b, 2)],
        out_specs=vec_out(256),
        out_shape=jax.ShapeDtypeStruct((B, 1, 256), jnp.float32),
        compiler_params=cp_grid,
    )(x, mw1, c1_b, mc2, c2_b, c3_w, c3_b)

    return out.reshape(B, 256)


# ---------------------------------------------------------------------------
# Deterministic parameter init (inference-mode BN folded; weights in bf16)
# ---------------------------------------------------------------------------
def init_params(key, input_dim):
    keys = iter(jax.random.split(key, 128))

    def lin(cin, cout):
        w = jax.random.normal(next(keys), (cin, cout), jnp.float32) / jnp.sqrt(
            jnp.float32(cin))
        b = 0.1 * jax.random.normal(next(keys), (1, cout), jnp.float32)
        return w, b

    def bn(c):
        gamma = 1.0 + 0.1 * jax.random.normal(next(keys), (c,), jnp.float32)
        beta = 0.1 * jax.random.normal(next(keys), (c,), jnp.float32)
        mean = 0.1 * jax.random.normal(next(keys), (c,), jnp.float32)
        var = 1.0 + 0.1 * jnp.abs(jax.random.normal(next(keys), (c,), jnp.float32))
        return gamma, beta, mean, var

    def fold(w, b, bnp):
        gamma, beta, mean, var = bnp
        scale = gamma / jnp.sqrt(var + EPS)
        return w * scale[None, :], (b - mean[None, :]) * scale[None, :] + beta[None, :]

    def mlp_pts(cin):
        w1, b1 = fold(*lin(cin, 64), bn(64))
        w2, b2 = fold(*lin(64, 128), bn(128))
        w3, b3 = fold(*lin(128, 1024), bn(1024))
        return (w1, b1, w2, b2, w3, b3)

    def fc_head(k):
        f1w, f1b = fold(*lin(1024, 512), bn(512))
        f2w, f2b = fold(*lin(512, 256), bn(256))
        f3w, f3b = lin(256, k * k)
        f3b = f3b + jnp.eye(k, dtype=jnp.float32).reshape(1, k * k)  # + identity
        return (f1w, f1b, f2w, f2b, f3w, f3b)

    stn_pts = mlp_pts(input_dim)
    stn_head = fc_head(3)
    c1 = fold(*lin(input_dim, 64), bn(64))
    fstn_pts = mlp_pts(64)
    fstn_head = fc_head(64)
    c2 = fold(*lin(64, 128), bn(128))
    c3 = fold(*lin(128, 256), bn(256))

    def cast(group):  # weights -> bf16 (MXU native), biases stay f32
        return tuple(a.astype(BF16) if i % 2 == 0 else a for i, a in enumerate(group))

    return {"stn_pts": cast(stn_pts), "stn_head": cast(stn_head),
            "conv1": cast(c1), "fstn_pts": cast(fstn_pts),
            "fstn_head": cast(fstn_head), "conv23": cast(c2 + c3)}


# ---------------------------------------------------------------------------
# Pure-JAX reference mirroring the kernel numerics (bf16 matmuls, f32 accum,
# folded per-batch conv1/conv2 weights -- same fold glue as the kernel path)
# ---------------------------------------------------------------------------
def reference_forward(x, params):
    def rdot(a, b):
        return jnp.matmul(a.astype(BF16), b.astype(BF16),
                          preferred_element_type=jnp.float32)

    def bdot(a, b):  # per-batch weights: (B, N, Cin) @ (B, Cin, Cout)
        return jnp.einsum("bnd,bdk->bnk", a.astype(BF16), b.astype(BF16),
                          preferred_element_type=jnp.float32)

    relu = jax.nn.relu
    s_w1, s_b1, s_w2, s_b2, s_w3, s_b3 = params["stn_pts"]
    sf1w, sf1b, sf2w, sf2b, sf3w, sf3b = params["stn_head"]
    c1_w, c1_b = params["conv1"]
    f_w1, f_b1, f_w2, f_b2, f_w3, f_b3 = params["fstn_pts"]
    ff1w, ff1b, ff2w, ff2b, ff3w, ff3b = params["fstn_head"]
    c2_w, c2_b, c3_w, c3_b = params["conv23"]
    B, N, D = x.shape

    def mlp_max(v, w1, b1, w2, b2, w3, b3):
        h = relu(rdot(v, w1) + b1)
        h = relu(rdot(h, w2) + b2)
        h = relu(rdot(h, w3) + b3)
        return jnp.max(h, axis=1)                    # (B, 1024)

    def head(g, w1, b1, w2, b2, w3, b3):
        g = relu(rdot(g, w1) + b1)
        g = relu(rdot(g, w2) + b2)
        return rdot(g, w3) + b3

    g = mlp_max(x, s_w1, s_b1, s_w2, s_b2, s_w3, s_b3)
    t9 = head(g, sf1w, sf1b, sf2w, sf2b, sf3w, sf3b)           # (B, 9)

    mw1 = _fold_conv1(t9, c1_w, B, D)                          # (B, D, 64) bf16
    h1 = relu(bdot(x, mw1) + c1_b)                             # (B, N, 64)

    gf = mlp_max(h1, f_w1, f_b1, f_w2, f_b2, f_w3, f_b3)
    tf_flat = head(gf, ff1w, ff1b, ff2w, ff2b, ff3w, ff3b)     # (B, 4096)

    mc2 = _fold_conv2(tf_flat, c2_w, B)                        # (B, 64, 128) bf16
    h = relu(bdot(h1, mc2) + c2_b)
    h = rdot(h, c3_w) + c3_b
    return jnp.max(h, axis=1)                                  # (B, 256)


# ---------------------------------------------------------------------------
if __name__ == "__main__":
    key = jax.random.PRNGKey(0)
    kx, kp = jax.random.split(key)

    B, N, D = 2, 128, 6          # (batch, points, per-point channels), D > 3 path
    x = jax.random.normal(kx, (B, N, D), jnp.float32)
    params = init_params(kp, D)

    out = pointnet_encoder_forward(x, params)
    out = jax.block_until_ready(out)
    assert out.shape == (B, 256)

    ref = reference_forward(x, params)
    if not jnp.allclose(out, ref, rtol=2e-2, atol=2e-2):
        err = float(jnp.max(jnp.abs(out - ref)))
        raise AssertionError(f"Pallas output mismatch vs reference, max abs err {err}")

    print("KERNEL_OK")
</pallas_src>

<mosaic_0001>
module attributes {stable_mosaic.version = 11 : i64} {
  func.func @stn_points_kernel(%arg0: i32, %arg1: i32, %arg2: memref<1x128x6xf32, #tpu.memory_space<vmem>>, %arg3: memref<6x64xbf16, #tpu.memory_space<vmem>>, %arg4: memref<1x64xf32, #tpu.memory_space<vmem>>, %arg5: memref<64x128xbf16, #tpu.memory_space<vmem>>, %arg6: memref<1x128xf32, #tpu.memory_space<vmem>>, %arg7: memref<128x1024xbf16, #tpu.memory_space<vmem>>, %arg8: memref<1x1024xf32, #tpu.memory_space<vmem>>, %arg9: memref<1x1x1024xf32, #tpu.memory_space<vmem>>) attributes {dimension_semantics = [#tpu.dimension_semantics<parallel>, #tpu.dimension_semantics<arbitrary>], iteration_bounds = array<i64: 2, 1>, scalar_prefetch = 0 : i64, scratch_operands = 0 : i64, tpu.core_type = #tpu.core_type<tc>, window_params = [{transform_indices = @transform_0, window_bounds = array<i64: 1, 128, 6>}, {pipeline_mode = #tpu.pipeline_mode<synchronous>, transform_indices = @transform_1, window_bounds = array<i64: 6, 64>}, {pipeline_mode = #tpu.pipeline_mode<synchronous>, transform_indices = @transform_2, window_bounds = array<i64: 1, 64>}, {pipeline_mode = #tpu.pipeline_mode<synchronous>, transform_indices = @transform_3, window_bounds = array<i64: 64, 128>}, {pipeline_mode = #tpu.pipeline_mode<synchronous>, transform_indices = @transform_4, window_bounds = array<i64: 1, 128>}, {pipeline_mode = #tpu.pipeline_mode<synchronous>, transform_indices = @transform_5, window_bounds = array<i64: 128, 1024>}, {pipeline_mode = #tpu.pipeline_mode<synchronous>, transform_indices = @transform_6, window_bounds = array<i64: 1, 1024>}, {transform_indices = @transform_7, window_bounds = array<i64: 1, 1, 1024>}]} {
    %c0 = arith.constant 0 : index
    %c0_0 = arith.constant 0 : index
    %c0_1 = arith.constant 0 : index
    %0 = vector.load %arg2[%c0, %c0_0, %c0_1] : memref<1x128x6xf32, #tpu.memory_space<vmem>>, vector<1x128x6xf32>
    %1 = vector.shape_cast %0 : vector<1x128x6xf32> to vector<128x6xf32>
    %c0_2 = arith.constant 0 : index
    %c0_3 = arith.constant 0 : index
    %2 = vector.load %arg3[%c0_2, %c0_3] : memref<6x64xbf16, #tpu.memory_space<vmem>>, vector<6x64xbf16>
    %c0_4 = arith.constant 0 : index
    %c0_5 = arith.constant 0 : index
    %3 = vector.load %arg4[%c0_4, %c0_5] : memref<1x64xf32, #tpu.memory_space<vmem>>, vector<1x64xf32>
    %c0_6 = arith.constant 0 : index
    %c0_7 = arith.constant 0 : index
    %4 = vector.load %arg5[%c0_6, %c0_7] : memref<64x128xbf16, #tpu.memory_space<vmem>>, vector<64x128xbf16>
    %c0_8 = arith.constant 0 : index
    %c0_9 = arith.constant 0 : index
    %5 = vector.load %arg6[%c0_8, %c0_9] : memref<1x128xf32, #tpu.memory_space<vmem>>, vector<1x128xf32>
    %c0_10 = arith.constant 0 : index
    %c0_11 = arith.constant 0 : index
    %6 = vector.load %arg7[%c0_10, %c0_11] : memref<128x1024xbf16, #tpu.memory_space<vmem>>, vector<128x1024xbf16>
    %c0_12 = arith.constant 0 : index
    %c0_13 = arith.constant 0 : index
    %7 = vector.load %arg8[%c0_12, %c0_13] : memref<1x1024xf32, #tpu.memory_space<vmem>>, vector<1x1024xf32>
    %8 = arith.truncf %1 : vector<128x6xf32> to vector<128x6xbf16>
    %cst = arith.constant dense<0.000000e+00> : vector<128x64xf32>
    %9 = tpu.matmul %8, %2, %cst {dimension_numbers = #tpu.dot_dimension_numbers<[1], [0], [0], [1], [0, 0, 1, 1], [], []>} : vector<128x6xbf16>, vector<6x64xbf16>, vector<128x64xf32> -> vector<128x64xf32>
    %10 = vector.broadcast %3 : vector<1x64xf32> to vector<128x64xf32>
    %11 = arith.addf %9, %10 : vector<128x64xf32>
    %cst_14 = arith.constant 0.000000e+00 : f32
    %12 = vector.broadcast %cst_14 : f32 to vector<128x64xf32>
    %13 = arith.maximumf %11, %12 : vector<128x64xf32>
    %14 = arith.truncf %13 : vector<128x64xf32> to vector<128x64xbf16>
    %cst_15 = arith.constant dense<0.000000e+00> : vector<128x128xf32>
    %15 = tpu.matmul %14, %4, %cst_15 {dimension_numbers = #tpu.dot_dimension_numbers<[1], [0], [0], [1], [0, 0, 1, 1], [], []>} : vector<128x64xbf16>, vector<64x128xbf16>, vector<128x128xf32> -> vector<128x128xf32>
    %16 = vector.broadcast %5 : vector<1x128xf32> to vector<128x128xf32>
    %17 = arith.addf %15, %16 : vector<128x128xf32>
    %cst_16 = arith.constant 0.000000e+00 : f32
    %18 = vector.broadcast %cst_16 : f32 to vector<128x128xf32>
    %19 = arith.maximumf %17, %18 : vector<128x128xf32>
    %20 = arith.truncf %19 : vector<128x128xf32> to vector<128x128xbf16>
    %cst_17 = arith.constant dense<0.000000e+00> : vector<128x1024xf32>
    %21 = tpu.matmul %20, %6, %cst_17 {dimension_numbers = #tpu.dot_dimension_numbers<[1], [0], [0], [1], [0, 0, 1, 1], [], []>} : vector<128x128xbf16>, vector<128x1024xbf16>, vector<128x1024xf32> -> vector<128x1024xf32>
    %22 = vector.broadcast %7 : vector<1x1024xf32> to vector<128x1024xf32>
    %23 = arith.addf %21, %22 : vector<128x1024xf32>
    %cst_18 = arith.constant 0.000000e+00 : f32
    %24 = vector.broadcast %cst_18 : f32 to vector<128x1024xf32>
    %25 = arith.maximumf %23, %24 : vector<128x1024xf32>
    %cst_19 = arith.constant dense<0xFF800000> : vector<1024xf32>
    %26 = vector.multi_reduction <maximumf>, %25, %cst_19 [0] : vector<128x1024xf32> to vector<1024xf32>
    %27 = vector.shape_cast %26 : vector<1024xf32> to vector<1x1024xf32>
    %c0_i32 = arith.constant 0 : i32
    %28 = arith.cmpi eq, %arg1, %c0_i32 : i32
    %29 = arith.extui %28 : i1 to i32
    %c0_i32_20 = arith.constant 0 : i32
    %30 = arith.cmpi ne, %29, %c0_i32_20 : i32
    scf.if %30 {
      %c0_23 = arith.constant 0 : index
      %c0_24 = arith.constant 0 : index
      %c0_25 = arith.constant 0 : index
      %34 = vector.load %arg9[%c0_23, %c0_24, %c0_25] : memref<1x1x1024xf32, #tpu.memory_space<vmem>>, vector<1x1x1024xf32>
      %35 = vector.shape_cast %34 : vector<1x1x1024xf32> to vector<1x1024xf32>
      %36 = vector.shape_cast %27 : vector<1x1024xf32> to vector<1x1x1024xf32>
      tpu.vector_store %arg9[%c0_23, %c0_24, %c0_25], %36 {strides = array<i32>} : memref<1x1x1024xf32, #tpu.memory_space<vmem>>, vector<1x1x1024xf32>,
    } else {
    }
    %c0_i32_21 = arith.constant 0 : i32
    %31 = arith.cmpi sgt, %arg1, %c0_i32_21 : i32
    %32 = arith.extui %31 : i1 to i32
    %c0_i32_22 = arith.constant 0 : i32
    %33 = arith.cmpi ne, %32, %c0_i32_22 : i32
    scf.if %33 {
      %c0_23 = arith.constant 0 : index
      %c0_24 = arith.constant 0 : index
      %c0_25 = arith.constant 0 : index
      %34 = vector.load %arg9[%c0_23, %c0_24, %c0_25] : memref<1x1x1024xf32, #tpu.memory_space<vmem>>, vector<1x1x1024xf32>
      %35 = vector.shape_cast %34 : vector<1x1x1024xf32> to vector<1x1024xf32>
      %36 = arith.maximumf %35, %27 : vector<1x1024xf32>
      %c0_26 = arith.constant 0 : index
      %c0_27 = arith.constant 0 : index
      %c0_28 = arith.constant 0 : index
      %37 = vector.load %arg9[%c0_26, %c0_27, %c0_28] : memref<1x1x1024xf32, #tpu.memory_space<vmem>>, vector<1x1x1024xf32>
      %38 = vector.shape_cast %37 : vector<1x1x1024xf32> to vector<1x1024xf32>
      %39 = vector.shape_cast %36 : vector<1x1024xf32> to vector<1x1x1024xf32>
      tpu.vector_store %arg9[%c0_26, %c0_27, %c0_28], %39 {strides = array<i32>} : memref<1x1x1024xf32, #tpu.memory_space<vmem>>, vector<1x1x1024xf32>,
    } else {
    }
    return
  }
  func.func @transform_0(%arg0: i32, %arg1: i32) -> (i32, i32, i32) {
    %c0_i32 = arith.constant 0 : i32
    %c0_i32_0 = arith.constant 0 : i32
    return %arg0, %arg1, %c0_i32 : i32, i32, i32
  }
  func.func @transform_1(%arg0: i32, %arg1: i32) -> (i32, i32) {
    %c0_i32 = arith.constant 0 : i32
    %c0_i32_0 = arith.constant 0 : i32
    %c0_i32_1 = arith.constant 0 : i32
    return %c0_i32, %c0_i32_0 : i32, i32
  }
  func.func @transform_2(%arg0: i32, %arg1: i32) -> (i32, i32) {
    %c0_i32 = arith.constant 0 : i32
    %c0_i32_0 = arith.constant 0 : i32
    %c0_i32_1 = arith.constant 0 : i32
    return %c0_i32, %c0_i32_0 : i32, i32
  }
  func.func @transform_3(%arg0: i32, %arg1: i32) -> (i32, i32) {
    %c0_i32 = arith.constant 0 : i32
    %c0_i32_0 = arith.constant 0 : i32
    %c0_i32_1 = arith.constant 0 : i32
    return %c0_i32, %c0_i32_0 : i32, i32
  }
  func.func @transform_4(%arg0: i32, %arg1: i32) -> (i32, i32) {
    %c0_i32 = arith.constant 0 : i32
    %c0_i32_0 = arith.constant 0 : i32
    %c0_i32_1 = arith.constant 0 : i32
    return %c0_i32, %c0_i32_0 : i32, i32
  }
  func.func @transform_5(%arg0: i32, %arg1: i32) -> (i32, i32) {
    %c0_i32 = arith.constant 0 : i32
    %c0_i32_0 = arith.constant 0 : i32
    %c0_i32_1 = arith.constant 0 : i32
    return %c0_i32, %c0_i32_0 : i32, i32
  }
  func.func @transform_6(%arg0: i32, %arg1: i32) -> (i32, i32) {
    %c0_i32 = arith.constant 0 : i32
    %c0_i32_0 = arith.constant 0 : i32
    %c0_i32_1 = arith.constant 0 : i32
    return %c0_i32, %c0_i32_0 : i32, i32
  }
  func.func @transform_7(%arg0: i32, %arg1: i32) -> (i32, i32, i32) {
    %c0_i32 = arith.constant 0 : i32
    %c0_i32_0 = arith.constant 0 : i32
    %c0_i32_1 = arith.constant 0 : i32
    return %arg0, %c0_i32, %c0_i32_0 : i32, i32, i32
  }
}

</mosaic_0001>

<bundles_post_ra>
// kernel: tpu_custom_call.1
= control target key start
LH: loop header
LB: loop body
LE: loop exit
PB: predicated region body
PF: predicated region fallthrough
CT: control target
= control target key end

     0   :  { %12 = vsyncpa [#allocation3], 0  ;;  %s3000_s0 = inlined_call_operand.vmem [shape: f32[2,128,6], index: 0, kind: input, shape index: {}]   ;;  %s3001_s1 = inlined_call_operand.vmem [shape: bf16[6,64], index: 1, kind: input, shape index: {}]   ;;  %s3002_s2 = inlined_call_operand.vmem [shape: f32[1,64], index: 2, kind: input, shape index: {}]   ;;  %s3003_s3 = inlined_call_operand.vmem [shape: bf16[64,128], index: 3, kind: input, shape index: {}]   ;;  %s3004_s4 = inlined_call_operand.vmem [shape: f32[1,128], index: 4, kind: input, shape index: {}]   ;;  %s3005_s5 = inlined_call_operand.hbm [shape: bf16[128,1024], index: 5, kind: input, shape index: {}]   ;;  %s3006_s6 = inlined_call_operand.vmem [shape: f32[1,1024], index: 6, kind: input, shape index: {}]   ;;  %s3007_s7 = inlined_call_operand.hbm [shape: f32[2,1,1024], index: 7, kind: output, shape index: {}]  }
   0x1   :  { %13 = vsyncpa [#allocation4], 0 }
   0x2   :  { %15 = vsyncpa [#allocation4 + $0x1], 0  ;;  %s2489_s24 = smov 0   ;;  %s2491_s25 = smov 0  }
   0x3   :  { %s2493_s26 = smov 0   ;;  %s2495_s27 = smov 0  }
   0x4   :  { %s2497_s28 = smov 0   ;;  %s2499_s29 = smov 0  }
   0x5 LB: > { %s2090_s30 = sadd.s32 4294967295, %s2441_s29   ;;  %s2091_s8 = sadd.s32 4294967294, %s2441_s29   ;;  %s2441_s29 = sphi %s2499_s29, %s21_s29   ;;  %s2437_s28 = sphi %s2497_s28, %s3025_s28   ;;  %s2433_s27 = sphi %s2495_s27, %s3024_s27   ;;  %s2429_s26 = sphi %s2493_s26, %s3023_s26   ;;  %s2425_s25 = sphi %s2491_s25, %s3022_s25   ;;  %s2421_s24 = sphi %s2489_s24, %s3021_s24  }
   0x6   : > { %s33_s9 = sadd.s32 1, %s2437_s28  ;;  %s194_s10 = sadd.s32 1, %s2429_s26 }
   0x7   : > { %p35_p0 = scmp.ge.s32.totalorder %s33_s9, 2  ;;  %p204_p1 = scmp.ne.s32.totalorder %s2429_s26, %s2425_s25 }
   0x8   : > { %p205_p2 = scmp.eq.s32.totalorder %s2090_s30, 1  ;;  %p210_p3 = scmp.ne.s32.totalorder %s2425_s25, %s2421_s24 }
   0x9   : > { %s3027_s9 = smov (%p35_p0, %s33_s9), 0  ;;  %p211_p5 = scmp.eq.s32.totalorder %s2091_s8, 1 }
   0xa   : > { %p2529_p4 = por %p205_p2, %p204_p1  ;;  %s191_s12 = ssub.s32 %s2437_s28, %s3027_s9 }
   0xb   : > { %p2092_p6 = scmp.ge.s32.totalorder %s2441_s29, 1  ;;  %p192_p7 = scmp.eq.s32.totalorder %s191_s12, 0 }
   0xc   : > { %s3012_s11 = scalar_select %p2529_p4, 1, 0 }
   0xd   : > { %p2536_p8 = por %p211_p5, %p210_p3  ;;  %p218_p9 = scmp.lt.s32.totalorder %s2441_s29, 3 }
   0xe   : > { %s2542_s14 = scalar_select %p192_p7, %s2429_s26, %s194_s10  }
   0xf   : > { %s3013_s13 = scalar_select %p2536_p8, 1, 0 }
  0x10   : > { %p2544_p10 = pnand %p2092_p6, %p218_p9  ;;  %p2548_p11 = scmp.eq.s32.totalorder %s2090_s30, 0 }
  0x11   : > { %s2443_s17 = smov [#allocation2]   ;;  %s2331_s22 = scalar_lea.hbm %s3005_s5, 8192 }
  0x12   : > { %s3014_s15 = scalar_select %p2544_p10, 1, 0 }
  0x13   : > { %s3015_s16 = scalar_select %p2548_p11, 1, 0 }
  0x14   : > { %p2263_p12 = pneg %p2544_p10  ;;  %s242_s18 = sshll.u32 %s2443_s17, 4  ;;  %s243_s18 = int_to_ptr.vmem [resolvable:$true] %s242_s18 }
  0x15   : > { %p2332_p0 = scmp.ne.s32.totalorder %s3005_s5, %s2331_s22  ;;  %p2338_p5 = scmp.lt.u32.totalorder %s2331_s22, %s3005_s5 }
  0x16   : > { %p2556_p13 = pnand %p2548_p11, %p2263_p12 }
  0x18   : > { %p2333_p1 = pneg %p2556_p13 }
  0x1a   : > { %p2334_p2 = pnand %p2333_p1, %p2332_p0 }
  0x1c   : > { %p2335_p3 = pneg %p2334_p2 }
  0x1e   : > { %p2340_p6 = pnand %p2338_p5, %p2335_p3 }
  0x20   : > { %2343 = shalt.err (!%p2340_p6)
}
  0x21   : > { %s2344_s12 = scalar_lea.vmem %s243_s18, 8192  ;;  %p2352_p8 = scmp.lt.s32.totalorder %s243_s18, %s243_s18 }
  0x22   : > { %p2345_p7 = scmp.ne.s32.totalorder %s243_s18, %s2344_s12  ;;  %p2353_p4 = scmp.lt.s32.totalorder %s2344_s12, %s2344_s12 }
  0x24   : > { %p2347_p9 = pnand %p2345_p7, %p2333_p1  ;;  %p2354_p11 = por %p2353_p4, %p2352_p8 }
  0x26   : > { %p2348_p12 = pneg %p2347_p9 }
  0x28   : > { %p2355_p10 = pnand %p2354_p11, %p2348_p12 }
  0x2a   : > { %2358 = shalt.err (!%p2355_p10)
}
  0x2b   : > { %s2444_s17 = smov 512   ;;  %s2445_s20 = smov 32  }
  0x2c   : > { %2266 = dma.hbm_to_vmem [thread:$0]  (!%p2556_p13), %s3005_s5, 8192, %s243_s18, [#allocation3], %s2444_s17, %s2444_s17, %s2445_s20  }
  0x2d   : > { %p3017_p0 = scmp.ne.s32.totalorder %s3014_s15, 0 }
  0x2e   : > { %p3018_p2 = scmp.ne.s32.totalorder (!%p3017_p0), %s3015_s16, 0 }
  0x2f   : > { %274 = sbr.rel (%p3017_p0) target bundleno = 885 (0x375), region = 48 }
  0x36   : > { %2412 = dma.done.wait (%p3018_p2), [#allocation3], 8192  }
  0x37   : > { %2414 = vsyncadd (%p3018_p2), [#allocation3], 4294959104  ;;  %p311_p4 = scmp.lt.s32.totalorder %s2433_s27, 1  ;;  %vm452_vm0 = vcmask 1042432   ;;  %v337_v0 = vld [vmem:[%s3001_s1] sm:$0x7] }
  0x38   : > { %vm427_vm1 = vcmask 48128   ;;  %2256 = vmatprep.subr.msk.bf16.mxu0 %vm452_vm0, %v337_v0  ;;  %v454_v3 = vsel %vm452_vm0, %v337_v0, 0  ;;  %v2327_v15 = vld [vmem:[%s3003_s3] sm:$0xff]   ;;  %v2328_v16 = vld [vmem:[%s3003_s3 + $0x8] sm:$0xff]   ;;  %v2329_v28 = vld [vmem:[%s3003_s3 + $0x10] sm:$0xff]   ;;  %vm607_vm2 = vcmask 523264  }
  0x39   : > { %s312_s22 = scalar_select %p311_p4, %s2433_s27, 1  ;;  %2215 = vmatpush3.bf16.msra.mxu0 %v454_v3  ;;  %2232 = vmatprep.subr.bf16.mxu1 %v2327_v15  ;;  %v2330_v29 = vld [vmem:[%s3003_s3 + $0x18] sm:$0xff]   ;;  %v348_v30 = vld [vmem:[#allocation2] sm:$0xff]  ;;  %v2628_v32 = vld [vmem:[#allocation2 + $0x8] sm:$0xff] }
  0x3a   : > { %2233 = vmatpush3.bf16.msra.mxu1 %v2327_v15  ;;  %v352_v31 = vld [vmem:[#allocation2 + $0x20] sm:$0xff]  ;;  %v2630_v35 = vld [vmem:[#allocation2 + $0x28] sm:$0xff]  ;;  %s307_s12 = sand.u32 1, %s2425_s25   ;;  %s2192_s20 = sshll.u32 %s2433_s27, 7 }
  0x3b   : > { %s2191_s30 = sshll.u32 %s312_s22, 7  ;;  %2234 = vmatprep.subr.bf16.mxu1 %v2328_v16  ;;  %v2122_v33 = vcombine.low %v348_v30, %v352_v31  ;;  %v2123_v34 = vcombine.high %v348_v30, %v352_v31  ;;  %v356_v36 = vld [vmem:[#allocation2 + $0x40] sm:$0xff]  ;;  %v2124_v38 = vcombine.low %v2628_v32, %v2630_v35  ;;  %v2125_v39 = vcombine.high %v2628_v32, %v2630_v35  ;;  %s2097_s17 = sshll.u32 %s307_s12, 3 }
  0x3c   : > { %s2587_s10 = scalar_lea.vmem %s3000_s0, %s2191_s30  ;;  %v360_v37 = vld [vmem:[#allocation2 + $0x60] sm:$0xff]  ;;  %s309_s21 = scalar_lea.vmem [#allocation5], %s2097_s17 }
  0x3d   : > { %v321_v1 = vld [vmem:[%s2587_s10] sm:$0xff]  ;;  %v322_v2 = vld [vmem:[%s2587_s10 + $0x8] sm:$0xff]  ;;  %v323_v5 = vld [vmem:[%s2587_s10 + $0x10] sm:$0xff]  ;;  %v2131_v40 = vcombine.high %v356_v36, %v360_v37  ;;  %1114 = vmatprep.subr.bf16.mxu0 %v2123_v34  ;;  %v2130_v43 = vcombine.low %v356_v36, %v360_v37  ;;  %s2005_s23 = sshll.u32 %s309_s21, 4  ;;  %s2953_s19 = scalar_lea.hbm %s3007_s7, %s2192_s20  ;;  %s2955_s23 = int_to_ptr.vmem [resolvable:$true] %s2005_s23 }
  0x3e   : > { %v413_v4 = vpack.c.bf16 %v322_v2, %v321_v1  ;;  %v324_v6 = vld [vmem:[%s2587_s10 + $0x18] sm:$0xff]  ;;  %v325_v7 = vld [vmem:[%s2587_s10 + $0x20] sm:$0xff]  ;;  %v326_v9 = vld [vmem:[%s2587_s10 + $0x28] sm:$0xff]  ;;  %2235 = vmatpush3.bf16.msra.mxu1 %v2328_v16  ;;  %s1991_s27 = scalar_lea.sflag [#allocation4], %s307_s12  ;;  %s2359_s8 = scalar_lea.vmem %s2955_s23, 128 }
  0x3f   : > { %v414_v8 = vpack.c.bf16 %v324_v6, %v323_v5  ;;  %v415_v10 = vpack.c.bf16 %v326_v9, %v325_v7  ;;  %v327_v11 = vld [vmem:[%s2587_s10 + $0x30] sm:$0xff]  ;;  %v328_v12 = vld [vmem:[%s2587_s10 + $0x38] sm:$0xff]  ;;  %v329_v13 = vld [vmem:[%s2587_s10 + $0x40] sm:$0xff]  ;;  %2236 = vmatprep.subr.bf16.mxu1 %v2329_v28  ;;  %p2360_p8 = scmp.ne.s32.totalorder %s2955_s23, %s2359_s8  ;;  %p3019_p10 = scmp.ne.s32.totalorder %s3012_s11, 0 }
  0x40   : > { %2216 = vmatprep.mubr.msk.bf16.mxu0 %vm427_vm1, %v413_v4  ;;  %v330_v14 = vld [vmem:[%s2587_s10 + $0x48] sm:$0xff]  ;;  %v416_v17 = vpack.c.bf16 %v328_v12, %v327_v11  ;;  %v331_v19 = vld [vmem:[%s2587_s10 + $0x50] sm:$0xff]  ;;  %v332_v20 = vld [vmem:[%s2587_s10 + $0x58] sm:$0xff] }
  0x41   : > { %2217 = vmatmul.mubr.msk.bf16.vlgmr.msra.gmra.mrb[0].mxu0 %vm427_vm1, %v414_v8  ;;  %v417_v18 = vpack.c.bf16 %v330_v14, %v329_v13  ;;  %v333_v21 = vld [vmem:[%s2587_s10 + $0x60] sm:$0xff]  ;;  %v334_v22 = vld [vmem:[%s2587_s10 + $0x68] sm:$0xff]  ;;  %v418_v23 = vpack.c.bf16 %v332_v20, %v331_v19  ;;  %v335_v25 = vld [vmem:[%s2587_s10 + $0x70] sm:$0xff]  ;;  %p2361_p11 = pnand %p2360_p8, %p3019_p10 }
  0x42   : > { %2220 = vmatprep.mubr.msk.bf16.mxu0 %vm427_vm1, %v415_v10  ;;  %v419_v24 = vpack.c.bf16 %v334_v22, %v333_v21  ;;  %v336_v26 = vld [vmem:[%s2587_s10 + $0x78] sm:$0xff]  ;;  %2237 = vmatpush3.bf16.msra.mxu1 %v2329_v28  ;;  %v364_v41 = vld [vmem:[#allocation2 + $0x80] sm:$0xff]  ;;  %v357_v7 = vld [vmem:[#allocation2 + $0x48] sm:$0xff]  ;;  %s2448_s10 = smov [#allocation5]  }
  0x43   : > { %v420_v27 = vpack.c.bf16 %v336_v26, %v335_v25  ;;  %2238 = vmatprep.subr.bf16.mxu1 %v2330_v29  ;;  %v368_v42 = vld [vmem:[#allocation2 + $0xa0] sm:$0xff]  ;;  %1115 = vmatpush1.bf16.msra.mxu0 %v2122_v33  ;;  %v361_v8 = vld [vmem:[#allocation2 + $0x68] sm:$0xff]  ;;  %p2362_p13 = pneg %p2361_p11  ;;  %s2363_s18 = sshll.u32 %s2448_s10, 4  ;;  %s2364_s18 = int_to_ptr.vmem [resolvable:$false] %s2363_s18 }
  0x44   : > { %1116 = vmatprep.subr.bf16.mxu0 %v2131_v40  ;;  %v2139_v44 = vcombine.high %v364_v41, %v368_v42  ;;  %v372_v45 = vld [vmem:[#allocation2 + $0xc0] sm:$0xff]  ;;  %v2138_v47 = vcombine.low %v364_v41, %v368_v42  ;;  %v2133_v14 = vcombine.high %v357_v7, %v361_v8  ;;  %v373_v28 = vld [vmem:[#allocation2 + $0xc8] sm:$0xff]  ;;  %s2365_s15 = scalar_lea.vmem %s2364_s18, 256  ;;  %p2366_p1 = scmp.lt.s32.totalorder %s2955_s23, %s2364_s18 }
  0x45   : > { %v376_v46 = vld [vmem:[#allocation2 + $0xe0] sm:$0xff]  ;;  %v385_v40 = vld [vmem:[#allocation2 + $0x128] sm:$0xff]  ;;  %p2367_p3 = scmp.lt.s32.totalorder %s2365_s15, %s2359_s8 }
  0x46   : > { %2239 = vmatpush3.bf16.msra.mxu1 %v2330_v29  ;;  %v2147_v48 = vcombine.high %v372_v45, %v376_v46  ;;  %v380_v49 = vld [vmem:[#allocation2 + $0x100] sm:$0xff]  ;;  %v2146_v51 = vcombine.low %v372_v45, %v376_v46  ;;  %v377_v29 = vld [vmem:[#allocation2 + $0xe8] sm:$0xff] }
  0x47   : > { %1227 = vmatprep.subr.bf16.mxu1 %v2125_v39  ;;  %1117 = vmatpush1.bf16.msra.mxu0 %v2130_v43  ;;  %v384_v50 = vld [vmem:[#allocation2 + $0x120] sm:$0xff]  ;;  %v2149_v39 = vcombine.high %v373_v28, %v377_v29  ;;  %v2148_v46 = vcombine.low %v373_v28, %v377_v29  ;;  %v355_v29 = vld [vmem:[#allocation2 + $0x38] sm:$0xff]  ;;  %p2368_p5 = por %p2367_p3, %p2366_p1 }
  0x48   : > { %1118 = vmatprep.subr.bf16.mxu0 %v2139_v44  ;;  %v2155_v52 = vcombine.high %v380_v49, %v384_v50  ;;  %v388_v53 = vld [vmem:[#allocation2 + $0x140] sm:$0xff]  ;;  %v2154_v55 = vcombine.low %v380_v49, %v384_v50  ;;  %v389_v50 = vld [vmem:[#allocation2 + $0x148] sm:$0xff] }
  0x49   : > { %2221 = vmatmul.mubr.msk.bf16.gmra.mrb[4].mxu0 %vm427_vm1, %v416_v17  ;;  %v392_v54 = vld [vmem:[#allocation2 + $0x160] sm:$0xff]  ;;  %v365_v17 = vld [vmem:[#allocation2 + $0x88] sm:$0xff]  ;;  %p2369_p6 = pnand %p2368_p5, %p2362_p13 }
  0x4a   : > { %2224 = vmatprep.mubr.msk.bf16.mxu0 %vm427_vm1, %v417_v18  ;;  %v2163_v56 = vcombine.high %v388_v53, %v392_v54  ;;  %v2162_v57 = vcombine.low %v388_v53, %v392_v54  ;;  %v2639_v58 = vld [vmem:[%s3002_s2] ss:$0 sm:$0xff]  ;;  %v369_v18 = vld [vmem:[#allocation2 + $0xa8] sm:$0xff] }
  0x4b   : > { %1119 = vmatpush1.bf16.msra.mxu0 %v2138_v47  ;;  %v2141_v26 = vcombine.high %v365_v17, %v369_v18  ;;  %v2140_v34 = vcombine.low %v365_v17, %v369_v18  ;;  %v405_v17 = vld [vmem:[#allocation2 + $0x1c8] sm:$0xff] }
  0x4c   : > { %1120 = vmatprep.subr.bf16.mxu0 %v2147_v48 }
  0x4f   : > { %1121 = vmatpush1.bf16.msra.mxu0 %v2146_v51  ;;  %v393_v51 = vld [vmem:[#allocation2 + $0x168] sm:$0xff] }
  0x50   : > { %1122 = vmatprep.subr.bf16.mxu0 %v2155_v52 }
  0x51   : > { %2225 = vmatmul.mubr.msk.bf16.gmra.mrb[8].mxu0 %vm427_vm1, %v418_v23 }
  0x52   : > { %2228 = vmatprep.mubr.msk.bf16.mxu0 %vm427_vm1, %v419_v24  ;;  %v2132_v24 = vcombine.low %v357_v7, %v361_v8  ;;  %v396_v8 = vld [vmem:[#allocation2 + $0x180] sm:$0xff] }
  0x53   : > { %1123 = vmatpush1.bf16.msra.mxu0 %v2154_v55 }
  0x54   : > { %1124 = vmatprep.subr.bf16.mxu0 %v2163_v56 }
  0x57   : > { %1125 = vmatpush1.bf16.msra.mxu0 %v2162_v57 }
  0x59   : > { %2229 = vmatmul.mubr.msk.bf16.gmra.mrb[12].mxu0 %vm427_vm1, %v420_v27 }
 0x114   : > { %v2218_v59 = vpop.f32.mrb[0].mxu0 }
 0x115   : > { %v499_v60 = vadd.f32 %v2218_v59, %v2639_v58  ;;  %v490_v61 = vpop.f32.mrb[1].mxu0  ;;  %v2165_v59 = vcombine.high %v389_v50, %v393_v51 }
 0x116   : > { %v491_v62 = vadd.f32 %v2639_v58, %v490_v61  ;;  %v2219_v63 = vpop.f32.mrb[2].mxu0 }
 0x117   : > { %v502_v0 = vadd.f32 %v2219_v63, %v2639_v58  ;;  %v493_v1 = vpop.f32.mrb[3].mxu0  ;;  %v555_v3 = vmax.f32 %v499_v60, 0.0 }
 0x118   : > { %v494_v2 = vadd.f32 %v2639_v58, %v493_v1  ;;  %v553_v5 = vmax.f32 %v491_v62, 0.0 }
 0x119   : > { %v556_v4 = vmax.f32 %v502_v0, 0.0 }
 0x11a   : > { %v554_v6 = vmax.f32 %v494_v2, 0.0 }
 0x11b   : > { %v570_v9 = vpack.c.bf16 %v556_v4, %v555_v3  ;;  %v2164_v3 = vcombine.low %v389_v50, %v393_v51 }
 0x11c   : > { %v2222_v10 = vpop.f32.mrb[4].mxu0  ;;  %v569_v11 = vpack.c.bf16 %v554_v6, %v553_v5 }
 0x11d   : > { %v515_v12 = vadd.f32 %v2222_v10, %v2639_v58  ;;  %v506_v13 = vpop.f32.mrb[5].mxu0  ;;  %v397_v10 = vld [vmem:[#allocation2 + $0x188] sm:$0xff] }
 0x11e   : > { %v507_v15 = vadd.f32 %v2639_v58, %v506_v13  ;;  %2240 = vmatprep.mubr.msk.bf16.mxu1 %vm607_vm2, %v569_v11  ;;  %v2223_v16 = vpop.f32.mrb[6].mxu0 }
 0x11f   : > { %v559_v19 = vmax.f32 %v515_v12, 0.0  ;;  %v518_v20 = vadd.f32 %v2223_v16, %v2639_v58  ;;  %2241 = vmatmul.mubr.msk.bf16.vlgmr.msra.gmra.mrb[0].mxu1 %vm607_vm2, %v570_v9  ;;  %v509_v21 = vpop.f32.mrb[7].mxu0  ;;  %v400_v9 = vld [vmem:[#allocation2 + $0x1a0] sm:$0xff]  ;;  %v401_v12 = vld [vmem:[#allocation2 + $0x1a8] sm:$0xff] }
 0x120   : > { %v557_v22 = vmax.f32 %v507_v15, 0.0  ;;  %v510_v23 = vadd.f32 %v2639_v58, %v509_v21  ;;  %1228 = vmatpush1.bf16.msra.mxu1 %v2124_v38  ;;  %v381_v38 = vld [vmem:[#allocation2 + $0x108] sm:$0xff]  ;;  %v2171_v11 = vcombine.high %v396_v8, %v400_v9  ;;  %v2170_v13 = vcombine.low %v396_v8, %v400_v9  ;;  %v404_v15 = vld [vmem:[#allocation2 + $0x1c0] sm:$0xff]  ;;  %v374_v9 = vld [vmem:[#allocation2 + $0xd0] sm:$0xff] }
 0x121   : > { %v560_v25 = vmax.f32 %v518_v20, 0.0  ;;  %1229 = vmatprep.subr.bf16.mxu1 %v2133_v14  ;;  %v2157_v48 = vcombine.high %v381_v38, %v385_v40  ;;  %v2156_v55 = vcombine.low %v381_v38, %v385_v40  ;;  %v2172_v14 = vcombine.low %v397_v10, %v401_v12  ;;  %v408_v16 = vld [vmem:[#allocation2 + $0x1e0] sm:$0xff] }
 0x122   : > { %v558_v27 = vmax.f32 %v510_v23, 0.0  ;;  %1126 = vmatprep.subr.bf16.mxu0 %v2171_v11  ;;  %v2179_v18 = vcombine.high %v404_v15, %v408_v16  ;;  %v2178_v20 = vcombine.low %v404_v15, %v408_v16  ;;  %v2446_v23 = vmov 0   ;;  %v378_v11 = vld [vmem:[#allocation2 + $0xf0] sm:$0xff] }
 0x123   : > { %v572_v30 = vpack.c.bf16 %v560_v25, %v559_v19  ;;  %1127 = vmatpush1.bf16.msra.mxu0 %v2170_v13  ;;  %v409_v19 = vld [vmem:[#allocation2 + $0x1e8] sm:$0xff]  ;;  %1146 = vmatprep.mubr.bf16.mxu0 %v2446_v23  ;;  %v354_v25 = vld [vmem:[#allocation2 + $0x30] sm:$0xff]  ;;  %v379_v13 = vld [vmem:[#allocation2 + $0xf8] sm:$0xff] }
 0x124   : > { %v571_v31 = vpack.c.bf16 %v558_v27, %v557_v22  ;;  %v2226_v33 = vpop.f32.mrb[8].mxu0  ;;  %1230 = vmatpush1.bf16.msra.mxu1 %v2132_v24  ;;  %v2180_v21 = vcombine.low %v405_v17, %v409_v19  ;;  %v2181_v22 = vcombine.high %v405_v17, %v409_v19  ;;  %1128 = vmatprep.subr.bf16.mxu0 %v2179_v18  ;;  %v350_v24 = vld [vmem:[#allocation2 + $0x10] sm:$0xff] }
 0x125   : > { %v531_v36 = vadd.f32 %v2226_v33, %v2639_v58  ;;  %v522_v37 = vpop.f32.mrb[9].mxu0  ;;  %1231 = vmatprep.subr.bf16.mxu1 %v2141_v26  ;;  %v351_v26 = vld [vmem:[#allocation2 + $0x18] sm:$0xff]  ;;  %v2126_v27 = vcombine.low %v350_v24, %v354_v25  ;;  %v2127_v28 = vcombine.high %v350_v24, %v354_v25  ;;  %v2673_v33 = vld [vmem:[%s3004_s4] ss:$0 sm:$0xff] }
 0x126   : > { %2244 = vmatprep.mubr.msk.bf16.mxu1 %vm607_vm2, %v571_v31  ;;  %v523_v32 = vadd.f32 %v2639_v58, %v522_v37  ;;  %v2227_v35 = vpop.f32.mrb[10].mxu0  ;;  %v2129_v31 = vcombine.high %v351_v26, %v355_v29 }
 0x127   : > { %2245 = vmatmul.mubr.msk.bf16.gmra.mrb[4].mxu1 %vm607_vm2, %v572_v30  ;;  %v563_v41 = vmax.f32 %v531_v36, 0.0  ;;  %v534_v42 = vadd.f32 %v2227_v35, %v2639_v58  ;;  %v525_v43 = vpop.f32.mrb[11].mxu0  ;;  %1129 = vmatpush1.bf16.msra.mxu0 %v2178_v20  ;;  %v2128_v30 = vcombine.low %v351_v26, %v355_v29  ;;  %v2151_v20 = vcombine.high %v374_v9, %v378_v11  ;;  %v386_v26 = vld [vmem:[#allocation2 + $0x130] sm:$0xff] }
 0x128   : > { %v561_v44 = vmax.f32 %v523_v32, 0.0  ;;  %v526_v45 = vadd.f32 %v2639_v58, %v525_v43  ;;  %1232 = vmatpush1.bf16.msra.mxu1 %v2140_v34  ;;  %1340 = vmatprep.subr.bf16.mxu0 %v2127_v28  ;;  %v358_v43 = vld [vmem:[#allocation2 + $0x50] sm:$0xff]  ;;  %v387_v28 = vld [vmem:[#allocation2 + $0x138] sm:$0xff] }
 0x129   : > { %v564_v47 = vmax.f32 %v534_v42, 0.0  ;;  %1233 = vmatprep.subr.bf16.mxu1 %v2149_v39 }
 0x12a   : > { %v562_v49 = vmax.f32 %v526_v45, 0.0 }
 0x12b   : > { %v574_v52 = vpack.c.bf16 %v564_v47, %v563_v41  ;;  %v359_v47 = vld [vmem:[#allocation2 + $0x58] sm:$0xff] }
 0x12c   : > { %v573_v53 = vpack.c.bf16 %v562_v49, %v561_v44  ;;  %v2230_v54 = vpop.f32.mrb[12].mxu0  ;;  %1234 = vmatpush1.bf16.msra.mxu1 %v2148_v46  ;;  %v362_v46 = vld [vmem:[#allocation2 + $0x70] sm:$0xff] }
 0x12d   : > { %v547_v56 = vadd.f32 %v2230_v54, %v2639_v58  ;;  %v538_v57 = vpop.f32.mrb[13].mxu0  ;;  %1235 = vmatprep.subr.bf16.mxu1 %v2157_v48  ;;  %v363_v48 = vld [vmem:[#allocation2 + $0x78] sm:$0xff] }
 0x12e   : > { %2248 = vmatprep.mubr.msk.bf16.mxu1 %vm607_vm2, %v573_v53  ;;  %v539_v60 = vadd.f32 %v2639_v58, %v538_v57  ;;  %v2231_v61 = vpop.f32.mrb[14].mxu0  ;;  %v370_v57 = vld [vmem:[#allocation2 + $0xb0] sm:$0xff] }
 0x12f   : > { %2249 = vmatmul.mubr.msk.bf16.gmra.mrb[8].mxu1 %vm607_vm2, %v574_v52  ;;  %v567_v62 = vmax.f32 %v547_v56, 0.0  ;;  %v550_v63 = vadd.f32 %v2231_v61, %v2639_v58  ;;  %v541_v0 = vpop.f32.mrb[15].mxu0  ;;  %v366_v52 = vld [vmem:[#allocation2 + $0x90] sm:$0xff]  ;;  %v2137_v56 = vcombine.high %v359_v47, %v363_v48 }
 0x130   : > { %v565_v1 = vmax.f32 %v539_v60, 0.0  ;;  %v542_v2 = vadd.f32 %v2639_v58, %v541_v0  ;;  %1236 = vmatpush1.bf16.msra.mxu1 %v2156_v55  ;;  %v2173_v58 = vcombine.high %v397_v10, %v401_v12  ;;  %v2135_v55 = vcombine.high %v358_v43, %v362_v46  ;;  %v371_v60 = vld [vmem:[#allocation2 + $0xb8] sm:$0xff] }
 0x131   : > { %v568_v4 = vmax.f32 %v550_v63, 0.0  ;;  %1237 = vmatprep.subr.bf16.mxu1 %v2165_v59  ;;  %v367_v59 = vld [vmem:[#allocation2 + $0x98] sm:$0xff]  ;;  %v2142_v16 = vcombine.low %v366_v52, %v370_v57 }
 0x132   : > { %v566_v5 = vmax.f32 %v542_v2, 0.0  ;;  %v2134_v2 = vcombine.low %v358_v43, %v362_v46  ;;  %v375_v12 = vld [vmem:[#allocation2 + $0xd8] sm:$0xff]  ;;  %v2144_v17 = vcombine.low %v367_v59, %v371_v60 }
 0x133   : > { %v576_v6 = vpack.c.bf16 %v568_v4, %v567_v62  ;;  %v391_v43 = vld [vmem:[#allocation2 + $0x158] sm:$0xff] }
 0x134   : > { %v575_v7 = vpack.c.bf16 %v566_v5, %v565_v1  ;;  %1238 = vmatpush1.bf16.msra.mxu1 %v2164_v3  ;;  %v2136_v3 = vcombine.low %v359_v47, %v363_v48 }
 0x135   : > { %1239 = vmatprep.subr.bf16.mxu1 %v2173_v58 }
 0x136   : > { %2252 = vmatprep.mubr.msk.bf16.mxu1 %vm607_vm2, %v575_v7  ;;  %v2145_v7 = vcombine.high %v367_v59, %v371_v60  ;;  %v402_v60 = vld [vmem:[#allocation2 + $0x1b0] sm:$0xff] }
 0x137   : > { %2253 = vmatmul.mubr.msk.bf16.gmra.mrb[12].mxu1 %vm607_vm2, %v576_v6  ;;  %v2143_v6 = vcombine.high %v366_v52, %v370_v57 }
 0x138   : > { %1240 = vmatpush1.bf16.msra.mxu1 %v2172_v14  ;;  %1259 = vmatprep.mubr.bf16.mxu1 %v2446_v23 }
 0x139   : > { %1241 = vmatprep.subr.bf16.mxu1 %v2181_v22  ;;  %v382_v22 = vld [vmem:[#allocation2 + $0x110] sm:$0xff] }
 0x13a   : > { %v2158_v48 = vcombine.low %v382_v22, %v386_v26 }
 0x13c   : > { %1242 = vmatpush1.bf16.msra.mxu1 %v2180_v21  ;;  %v2153_v21 = vcombine.high %v375_v12, %v379_v13 }
 0x13d   : > { %1453 = vmatprep.subr.bf16.mxu1 %v2129_v31 }
 0x1f2   : > { %v2242_v34 = vpop.f32.mrb[0].mxu1 }
 0x1f3   : > { %v675_v36 = vadd.f32 %v2242_v34, %v2673_v33  ;;  %v666_v37 = vpop.f32.mrb[1].mxu1 }
 0x1f4   : > { %v667_v39 = vadd.f32 %v2673_v33, %v666_v37  ;;  %v2243_v32 = vpop.f32.mrb[2].mxu1  ;;  %v2150_v37 = vcombine.low %v374_v9, %v378_v11  ;;  %v406_v9 = vld [vmem:[#allocation2 + $0x1d0] sm:$0xff] }
 0x1f5   : > { %v678_v35 = vadd.f32 %v2243_v32, %v2673_v33  ;;  %v669_v38 = vpop.f32.mrb[3].mxu1  ;;  %v731_v41 = vmax.f32 %v675_v36, 0.0  ;;  %v410_v11 = vld [vmem:[#allocation2 + $0x1f0] sm:$0xff] }
 0x1f6   : > { %v670_v40 = vadd.f32 %v2673_v33, %v669_v38  ;;  %v729_v44 = vmax.f32 %v667_v39, 0.0  ;;  %v2152_v39 = vcombine.low %v375_v12, %v379_v13  ;;  %v407_v12 = vld [vmem:[#allocation2 + $0x1d8] sm:$0xff] }
 0x1f7   : > { %v732_v42 = vmax.f32 %v678_v35, 0.0  ;;  %v2159_v35 = vcombine.high %v382_v22, %v386_v26  ;;  %v411_v13 = vld [vmem:[#allocation2 + $0x1f8] sm:$0xff]  ;;  %v2770_v22 = vld [vmem:[%s3006_s6] sm:$0xff] }
 0x1f8   : > { %v730_v45 = vmax.f32 %v670_v40, 0.0  ;;  %v390_v40 = vld [vmem:[#allocation2 + $0x150] sm:$0xff] }
 0x1f9   : > { %v2679_v49 = vpack.c.bf16 %v732_v42, %v731_v41  ;;  %v394_v42 = vld [vmem:[#allocation2 + $0x170] sm:$0xff] }
 0x1fa   : > { %v2681_v50 = vpack.c.bf16 %v730_v45, %v729_v44  ;;  %v2246_v51 = vpop.f32.mrb[4].mxu1  ;;  %v395_v44 = vld [vmem:[#allocation2 + $0x178] sm:$0xff] }
 0x1fb   : > { %v691_v53 = vadd.f32 %v2246_v51, %v2673_v33  ;;  %v682_v54 = vpop.f32.mrb[5].mxu1 }
 0x1fc   : > { %v683_v61 = vadd.f32 %v2673_v33, %v682_v54  ;;  %1147 = vmatmul.mubr.bf16.vlgmr.msra.gmra.mrb[16].mxu0 %v2681_v50  ;;  %1260 = vmatmul.mubr.bf16.vlgmr.msra.gmra.mrb[16].mxu1 %v2681_v50  ;;  %v2247_v62 = vpop.f32.mrb[6].mxu1  ;;  %v2167_v54 = vcombine.high %v390_v40, %v394_v42 }
 0x1fd   : > { %v735_v63 = vmax.f32 %v691_v53, 0.0  ;;  %1341 = vmatpush1.bf16.msra.mxu0 %v2126_v27  ;;  %1454 = vmatpush1.bf16.msra.mxu1 %v2128_v30  ;;  %v694_v0 = vadd.f32 %v2247_v62, %v2673_v33  ;;  %v685_v1 = vpop.f32.mrb[7].mxu1  ;;  %v383_v27 = vld [vmem:[#allocation2 + $0x118] sm:$0xff] }
 0x1fe   : > { %v733_v4 = vmax.f32 %v683_v61, 0.0  ;;  %v686_v5 = vadd.f32 %v2673_v33, %v685_v1  ;;  %1156 = vmatprep.mubr.bf16.mxu0 %v2446_v23  ;;  %1269 = vmatprep.mubr.bf16.mxu1 %v2446_v23  ;;  %v2161_v38 = vcombine.high %v383_v27, %v387_v28  ;;  %v2160_v51 = vcombine.low %v383_v27, %v387_v28  ;;  %v399_v61 = vld [vmem:[#allocation2 + $0x198] sm:$0xff] }
 0x1ff   : > { %v736_v8 = vmax.f32 %v694_v0, 0.0  ;;  %1342 = vmatprep.subr.bf16.mxu0 %v2135_v55  ;;  %1455 = vmatprep.subr.bf16.mxu1 %v2137_v56  ;;  %v2169_v55 = vcombine.high %v391_v43, %v395_v44  ;;  %v398_v56 = vld [vmem:[#allocation2 + $0x190] sm:$0xff]  ;;  %v403_v62 = vld [vmem:[#allocation2 + $0x1b8] sm:$0xff] }
 0x200   : > { %v734_v10 = vmax.f32 %v686_v5, 0.0  ;;  %v2168_v5 = vcombine.low %v391_v43, %v395_v44 }
 0x201   : > { %v2691_v14 = vpack.c.bf16 %v736_v8, %v735_v63  ;;  %1343 = vmatpush1.bf16.msra.mxu0 %v2134_v2  ;;  %1456 = vmatpush1.bf16.msra.mxu1 %v2136_v3  ;;  %v2177_v8 = vcombine.high %v399_v61, %v403_v62 }
 0x202   : > { %v2693_v58 = vpack.c.bf16 %v734_v10, %v733_v4  ;;  %v2250_v15 = vpop.f32.mrb[8].mxu1  ;;  %1344 = vmatprep.subr.bf16.mxu0 %v2143_v6  ;;  %1457 = vmatprep.subr.bf16.mxu1 %v2145_v7  ;;  %v2166_v4 = vcombine.low %v390_v40, %v394_v42  ;;  %v2175_v7 = vcombine.high %v398_v56, %v402_v60 }
 0x203   : > { %v707_v18 = vadd.f32 %v2250_v15, %v2673_v33  ;;  %v698_v19 = vpop.f32.mrb[9].mxu1 }
 0x204   : > { %1157 = vmatmul.mubr.bf16.gmra.mrb[20].mxu0 %v2679_v49  ;;  %1270 = vmatmul.mubr.bf16.gmra.mrb[20].mxu1 %v2679_v49  ;;  %v699_v24 = vadd.f32 %v2673_v33, %v698_v19  ;;  %v2251_v25 = vpop.f32.mrb[10].mxu1  ;;  %v2185_v19 = vcombine.high %v407_v12, %v411_v13 }
 0x205   : > { %v739_v29 = vmax.f32 %v707_v18, 0.0  ;;  %1166 = vmatprep.mubr.bf16.mxu0 %v2446_v23  ;;  %1279 = vmatprep.mubr.bf16.mxu1 %v2446_v23  ;;  %v710_v30 = vadd.f32 %v2251_v25, %v2673_v33  ;;  %v701_v31 = vpop.f32.mrb[11].mxu1  ;;  %v2176_v18 = vcombine.low %v399_v61, %v403_v62 }
 0x206   : > { %v737_v34 = vmax.f32 %v699_v24, 0.0  ;;  %1345 = vmatpush1.bf16.msra.mxu0 %v2142_v16  ;;  %1458 = vmatpush1.bf16.msra.mxu1 %v2144_v17  ;;  %v702_v36 = vadd.f32 %v2673_v33, %v701_v31  ;;  %v2174_v17 = vcombine.low %v398_v56, %v402_v60 }
 0x207   : > { %v740_v32 = vmax.f32 %v710_v30, 0.0  ;;  %1346 = vmatprep.subr.bf16.mxu0 %v2151_v20  ;;  %1459 = vmatprep.subr.bf16.mxu1 %v2153_v21  ;;  %v2182_v20 = vcombine.low %v406_v9, %v410_v11  ;;  %v2184_v21 = vcombine.low %v407_v12, %v411_v13 }
 0x208   : > { %v738_v41 = vmax.f32 %v702_v36, 0.0 }
 0x209   : > { %v2703_v45 = vpack.c.bf16 %v740_v32, %v739_v29 }
 0x20a   : > { %v2705_v46 = vpack.c.bf16 %v738_v41, %v737_v34  ;;  %1347 = vmatpush1.bf16.msra.mxu0 %v2150_v37  ;;  %1460 = vmatpush1.bf16.msra.mxu1 %v2152_v39  ;;  %v2254_v47 = vpop.f32.mrb[12].mxu1 }
 0x20b   : > { %v723_v52 = vadd.f32 %v2254_v47, %v2673_v33  ;;  %1348 = vmatprep.subr.bf16.mxu0 %v2159_v35  ;;  %1461 = vmatprep.subr.bf16.mxu1 %v2161_v38  ;;  %v714_v53 = vpop.f32.mrb[13].mxu1 }
 0x20c   : > { %1167 = vmatmul.mubr.bf16.gmra.mrb[24].mxu0 %v2693_v58  ;;  %1280 = vmatmul.mubr.bf16.gmra.mrb[24].mxu1 %v2693_v58  ;;  %v715_v57 = vadd.f32 %v2673_v33, %v714_v53  ;;  %v2255_v59 = vpop.f32.mrb[14].mxu1 }
 0x20d   : > { %1176 = vmatprep.mubr.bf16.mxu0 %v2446_v23  ;;  %1289 = vmatprep.mubr.bf16.mxu1 %v2446_v23  ;;  %v743_v63 = vmax.f32 %v723_v52, 0.0  ;;  %v726_v0 = vadd.f32 %v2255_v59, %v2673_v33  ;;  %v717_v1 = vpop.f32.mrb[15].mxu1 }
 0x20e   : > { %v741_v2 = vmax.f32 %v715_v57, 0.0  ;;  %1349 = vmatpush1.bf16.msra.mxu0 %v2158_v48  ;;  %1462 = vmatpush1.bf16.msra.mxu1 %v2160_v51  ;;  %v718_v3 = vadd.f32 %v2673_v33, %v717_v1  ;;  %v2183_v33 = vcombine.high %v406_v9, %v410_v11 }
 0x20f   : > { %v744_v6 = vmax.f32 %v726_v0, 0.0  ;;  %1350 = vmatprep.subr.bf16.mxu0 %v2167_v54  ;;  %1463 = vmatprep.subr.bf16.mxu1 %v2169_v55 }
 0x210   : > { %v742_v10 = vmax.f32 %v718_v3, 0.0 }
 0x211   : > { %v2715_v15 = vpack.c.bf16 %v744_v6, %v743_v63 }
 0x212   : > { %v751_v16 = vpack.c.bf16 %v742_v10, %v741_v2  ;;  %1351 = vmatpush1.bf16.msra.mxu0 %v2166_v4  ;;  %1464 = vmatpush1.bf16.msra.mxu1 %v2168_v5 }
 0x213   : > { %1352 = vmatprep.subr.bf16.mxu0 %v2175_v7  ;;  %1465 = vmatprep.subr.bf16.mxu1 %v2177_v8 }
 0x214   : > { %1177 = vmatmul.mubr.bf16.gmra.mrb[28].mxu0 %v2691_v14  ;;  %1290 = vmatmul.mubr.bf16.gmra.mrb[28].mxu1 %v2691_v14 }
 0x215   : > { %1186 = vmatprep.mubr.bf16.mxu0 %v2446_v23  ;;  %1299 = vmatprep.mubr.bf16.mxu1 %v2446_v23 }
 0x216   : > { %1353 = vmatpush1.bf16.msra.mxu0 %v2174_v17  ;;  %1466 = vmatpush1.bf16.msra.mxu1 %v2176_v18 }
 0x217   : > { %1354 = vmatprep.subr.bf16.mxu0 %v2183_v33  ;;  %1467 = vmatprep.subr.bf16.mxu1 %v2185_v19 }
 0x21a   : > { %1355 = vmatpush1.bf16.msra.mxu0 %v2182_v20  ;;  %1468 = vmatpush1.bf16.msra.mxu1 %v2184_v21 }
 0x21c   : > { %1187 = vmatmul.mubr.bf16.gmra.mrb[32].mxu0 %v2705_v46  ;;  %1300 = vmatmul.mubr.bf16.gmra.mrb[32].mxu1 %v2705_v46 }
 0x21d   : > { %1196 = vmatprep.mubr.bf16.mxu0 %v2446_v23  ;;  %1309 = vmatprep.mubr.bf16.mxu1 %v2446_v23 }
 0x224   : > { %1197 = vmatmul.mubr.bf16.gmra.mrb[36].mxu0 %v2703_v45  ;;  %1310 = vmatmul.mubr.bf16.gmra.mrb[36].mxu1 %v2703_v45 }
 0x225   : > { %1206 = vmatprep.mubr.bf16.mxu0 %v2446_v23  ;;  %1319 = vmatprep.mubr.bf16.mxu1 %v2446_v23 }
 0x22c   : > { %1207 = vmatmul.mubr.bf16.gmra.mrb[40].mxu0 %v751_v16  ;;  %1320 = vmatmul.mubr.bf16.gmra.mrb[40].mxu1 %v751_v16 }
 0x22d   : > { %1216 = vmatprep.mubr.bf16.mxu0 %v2446_v23  ;;  %1329 = vmatprep.mubr.bf16.mxu1 %v2446_v23 }
 0x234   : > { %1217 = vmatmul.mubr.bf16.gmra.mrb[44].mxu0 %v2715_v15  ;;  %1330 = vmatmul.mubr.bf16.gmra.mrb[44].mxu1 %v2715_v15 }
 0x235   : > { %1372 = vmatprep.mubr.bf16.mxu0 %v2446_v23  ;;  %1485 = vmatprep.mubr.bf16.mxu1 %v2446_v23 }
 0x23c   : > { %1373 = vmatmul.mubr.bf16.vlgmr.msra.gmra.mrb[48].mxu0 %v2681_v50  ;;  %1486 = vmatmul.mubr.bf16.vlgmr.msra.gmra.mrb[48].mxu1 %v2681_v50 }
 0x23d   : > { %1382 = vmatprep.mubr.bf16.mxu0 %v2446_v23  ;;  %1495 = vmatprep.mubr.bf16.mxu1 %v2446_v23 }
 0x244   : > { %1383 = vmatmul.mubr.bf16.gmra.mrb[52].mxu0 %v2679_v49  ;;  %1496 = vmatmul.mubr.bf16.gmra.mrb[52].mxu1 %v2679_v49  ;;  %v754_v49 = vlaneseq }
 0x245   : > { %1392 = vmatprep.mubr.bf16.mxu0 %v2446_v23  ;;  %1505 = vmatprep.mubr.bf16.mxu1 %v2446_v23 }
 0x246   : > { %v2763_v50 = vshrl.u32 %v754_v49, 7 }
 0x248   : > { %v760_v24 = vsub.s32 1, %v2763_v50 }
 0x24a   : > { %v2781_v27 = vrot.slane %v2770_v22, %v760_v24 }
 0x24c   : > { %1393 = vmatmul.mubr.bf16.gmra.mrb[56].mxu0 %v2693_v58  ;;  %1506 = vmatmul.mubr.bf16.gmra.mrb[56].mxu1 %v2693_v58  ;;  %v764_v58 = vsub.s32 2, %v2763_v50 }
 0x24d   : > { %1402 = vmatprep.mubr.bf16.mxu0 %v2446_v23  ;;  %1515 = vmatprep.mubr.bf16.mxu1 %v2446_v23 }
 0x24e   : > { %v2778_v26 = vrot.slane %v2770_v22, %v764_v58 }
 0x254   : > { %1403 = vmatmul.mubr.bf16.gmra.mrb[60].mxu0 %v2691_v14  ;;  %1516 = vmatmul.mubr.bf16.gmra.mrb[60].mxu1 %v2691_v14  ;;  %v756_v14 = vsub.s32 0, %v2763_v50 }
 0x255   : > { %1412 = vmatprep.mubr.bf16.mxu0 %v2446_v23  ;;  %1525 = vmatprep.mubr.bf16.mxu1 %v2446_v23 }
 0x256   : > { %v2775_v25 = vrot.slane %v2770_v22, %v756_v14 }
 0x25c   : > { %1413 = vmatmul.mubr.bf16.gmra.mrb[64].mxu0 %v2705_v46  ;;  %1526 = vmatmul.mubr.bf16.gmra.mrb[64].mxu1 %v2705_v46 }
 0x25d   : > { %1422 = vmatprep.mubr.bf16.mxu0 %v2446_v23  ;;  %1535 = vmatprep.mubr.bf16.mxu1 %v2446_v23 }
 0x264   : > { %1423 = vmatmul.mubr.bf16.gmra.mrb[68].mxu0 %v2703_v45  ;;  %1536 = vmatmul.mubr.bf16.gmra.mrb[68].mxu1 %v2703_v45 }
 0x265   : > { %1432 = vmatprep.mubr.bf16.mxu0 %v2446_v23  ;;  %1545 = vmatprep.mubr.bf16.mxu1 %v2446_v23 }
 0x26c   : > { %1433 = vmatmul.mubr.bf16.gmra.mrb[72].mxu0 %v751_v16  ;;  %1546 = vmatmul.mubr.bf16.gmra.mrb[72].mxu1 %v751_v16 }
 0x26d   : > { %1442 = vmatprep.mubr.bf16.mxu0 %v2446_v23  ;;  %1555 = vmatprep.mubr.bf16.mxu1 %v2446_v23  ;;  %v768_v23 = vsub.s32 3, %v2763_v50 }
 0x26f   : > { %v2784_v28 = vrot.slane %v2770_v22, %v768_v23 }
 0x274   : > { %1443 = vmatmul.mubr.bf16.gmra.mrb[76].mxu0 %v2715_v15  ;;  %1556 = vmatmul.mubr.bf16.gmra.mrb[76].mxu1 %v2715_v15 }
 0x2cf   : > { %v1148_v29 = vpop.f32.mrb[16].mxu0  ;;  %v1261_v30 = vpop.f32.mrb[16].mxu1 }
 0x2d0   : > { %v1149_v31 = vadd.f32 %v1148_v29, %v2775_v25  ;;  %v1262_v34 = vadd.f32 %v1261_v30, %v2778_v26  ;;  %v1150_v36 = vpop.f32.mrb[17].mxu0  ;;  %v1263_v37 = vpop.f32.mrb[17].mxu1 }
 0x2d1   : > { %v1151_v39 = vadd.f32 %v1150_v36, %v2781_v27  ;;  %v1264_v32 = vadd.f32 %v1263_v37, %v2784_v28  ;;  %v1152_v35 = vpop.f32.mrb[18].mxu0  ;;  %v1265_v38 = vpop.f32.mrb[18].mxu1 }
 0x2d2   : > { %v1153_v40 = vadd.f32 %v1152_v35, %v2775_v25  ;;  %v1266_v41 = vadd.f32 %v1265_v38, %v2778_v26  ;;  %v1154_v42 = vpop.f32.mrb[19].mxu0  ;;  %v1267_v43 = vpop.f32.mrb[19].mxu1  ;;  %v1566_v46 = vmax.f32 %v1149_v31, 0.0  ;;  %v1568_v47 = vmax.f32 %v1262_v34, 0.0 }
 0x2d3   : > { %v1155_v44 = vadd.f32 %v1154_v42, %v2781_v27  ;;  %v1268_v45 = vadd.f32 %v1267_v43, %v2784_v28  ;;  %v1567_v52 = vmax.f32 %v1151_v39, 0.0  ;;  %v1569_v53 = vmax.f32 %v1264_v32, 0.0 }
 0x2d4   : > { %v1574_v48 = vmax.f32 %v1153_v40, 0.0  ;;  %v1576_v51 = vmax.f32 %v1266_v41, 0.0 }
 0x2d5   : > { %v1575_v54 = vmax.f32 %v1155_v44, 0.0  ;;  %v1577_v55 = vmax.f32 %v1268_v45, 0.0 }
 0x2d6   : > { %v1694_v56 = vmax.f32 %v1566_v46, %v1574_v48  ;;  %v1736_v57 = vmax.f32 %v1568_v47, %v1576_v51 }
 0x2d7   : > { %v1715_v59 = vmax.f32 %v1567_v52, %v1575_v54  ;;  %v1757_v60 = vmax.f32 %v1569_v53, %v1577_v55  ;;  %v1158_v61 = vpop.f32.mrb[20].mxu0  ;;  %v1271_v62 = vpop.f32.mrb[20].mxu1 }
 0x2d8   : > { %v1159_v63 = vadd.f32 %v1158_v61, %v2775_v25  ;;  %v1272_v0 = vadd.f32 %v1271_v62, %v2778_v26  ;;  %v1160_v1 = vpop.f32.mrb[21].mxu0  ;;  %v1273_v2 = vpop.f32.mrb[21].mxu1 }
 0x2d9   : > { %v1161_v3 = vadd.f32 %v1160_v1, %v2781_v27  ;;  %v1274_v4 = vadd.f32 %v1273_v2, %v2784_v28  ;;  %v1162_v5 = vpop.f32.mrb[22].mxu0  ;;  %v1275_v6 = vpop.f32.mrb[22].mxu1 }
 0x2da   : > { %v1582_v7 = vmax.f32 %v1159_v63, 0.0  ;;  %v1584_v8 = vmax.f32 %v1272_v0, 0.0  ;;  %v1163_v9 = vadd.f32 %v1162_v5, %v2775_v25  ;;  %v1276_v10 = vadd.f32 %v1275_v6, %v2778_v26  ;;  %v1164_v11 = vpop.f32.mrb[23].mxu0  ;;  %v1277_v12 = vpop.f32.mrb[23].mxu1 }
 0x2db   : > { %v1583_v13 = vmax.f32 %v1161_v3, 0.0  ;;  %v1585_v15 = vmax.f32 %v1274_v4, 0.0  ;;  %v1165_v16 = vadd.f32 %v1164_v11, %v2781_v27  ;;  %v1278_v17 = vadd.f32 %v1277_v12, %v2784_v28 }
 0x2dc   : > { %v1695_v18 = vmax.f32 %v1694_v56, %v1582_v7  ;;  %v1737_v33 = vmax.f32 %v1736_v57, %v1584_v8  ;;  %v1590_v19 = vmax.f32 %v1163_v9, 0.0  ;;  %v1592_v20 = vmax.f32 %v1276_v10, 0.0 }
 0x2dd   : > { %v1716_v21 = vmax.f32 %v1715_v59, %v1583_v13  ;;  %v1758_v49 = vmax.f32 %v1757_v60, %v1585_v15  ;;  %v1591_v14 = vmax.f32 %v1165_v16, 0.0  ;;  %v1593_v58 = vmax.f32 %v1278_v17, 0.0 }
 0x2de   : > { %v1696_v24 = vmax.f32 %v1695_v18, %v1590_v19  ;;  %v1738_v23 = vmax.f32 %v1737_v33, %v1592_v20 }
 0x2df   : > { %v1717_v29 = vmax.f32 %v1716_v21, %v1591_v14  ;;  %v1759_v30 = vmax.f32 %v1758_v49, %v1593_v58  ;;  %v1168_v31 = vpop.f32.mrb[24].mxu0  ;;  %v1281_v34 = vpop.f32.mrb[24].mxu1 }
 0x2e0   : > { %v1169_v36 = vadd.f32 %v1168_v31, %v2775_v25  ;;  %v1282_v37 = vadd.f32 %v1281_v34, %v2778_v26  ;;  %v1170_v39 = vpop.f32.mrb[25].mxu0  ;;  %v1283_v32 = vpop.f32.mrb[25].mxu1 }
 0x2e1   : > { %v1171_v35 = vadd.f32 %v1170_v39, %v2781_v27  ;;  %v1284_v38 = vadd.f32 %v1283_v32, %v2784_v28  ;;  %v1172_v40 = vpop.f32.mrb[26].mxu0  ;;  %v1285_v41 = vpop.f32.mrb[26].mxu1 }
 0x2e2   : > { %v1598_v42 = vmax.f32 %v1169_v36, 0.0  ;;  %v1600_v43 = vmax.f32 %v1282_v37, 0.0  ;;  %v1173_v44 = vadd.f32 %v1172_v40, %v2775_v25  ;;  %v1286_v45 = vadd.f32 %v1285_v41, %v2778_v26  ;;  %v1174_v46 = vpop.f32.mrb[27].mxu0  ;;  %v1287_v47 = vpop.f32.mrb[27].mxu1 }
 0x2e3   : > { %v1599_v48 = vmax.f32 %v1171_v35, 0.0  ;;  %v1601_v51 = vmax.f32 %v1284_v38, 0.0  ;;  %v1175_v52 = vadd.f32 %v1174_v46, %v2781_v27  ;;  %v1288_v53 = vadd.f32 %v1287_v47, %v2784_v28 }
 0x2e4   : > { %v1697_v54 = vmax.f32 %v1696_v24, %v1598_v42  ;;  %v1739_v55 = vmax.f32 %v1738_v23, %v1600_v43  ;;  %v1606_v56 = vmax.f32 %v1173_v44, 0.0  ;;  %v1608_v57 = vmax.f32 %v1286_v45, 0.0 }
 0x2e5   : > { %v1718_v59 = vmax.f32 %v1717_v29, %v1599_v48  ;;  %v1760_v60 = vmax.f32 %v1759_v30, %v1601_v51  ;;  %v1607_v61 = vmax.f32 %v1175_v52, 0.0  ;;  %v1609_v62 = vmax.f32 %v1288_v53, 0.0 }
 0x2e6   : > { %v1698_v63 = vmax.f32 %v1697_v54, %v1606_v56  ;;  %v1740_v0 = vmax.f32 %v1739_v55, %v1608_v57 }
 0x2e7   : > { %v1719_v1 = vmax.f32 %v1718_v59, %v1607_v61  ;;  %v1761_v2 = vmax.f32 %v1760_v60, %v1609_v62  ;;  %v1178_v3 = vpop.f32.mrb[28].mxu0  ;;  %v1291_v4 = vpop.f32.mrb[28].mxu1 }
 0x2e8   : > { %v1179_v5 = vadd.f32 %v1178_v3, %v2775_v25  ;;  %v1292_v6 = vadd.f32 %v1291_v4, %v2778_v26  ;;  %v1180_v7 = vpop.f32.mrb[29].mxu0  ;;  %v1293_v8 = vpop.f32.mrb[29].mxu1 }
 0x2e9   : > { %v1181_v9 = vadd.f32 %v1180_v7, %v2781_v27  ;;  %v1294_v10 = vadd.f32 %v1293_v8, %v2784_v28  ;;  %v1182_v11 = vpop.f32.mrb[30].mxu0  ;;  %v1295_v12 = vpop.f32.mrb[30].mxu1 }
 0x2ea   : > { %v1614_v13 = vmax.f32 %v1179_v5, 0.0  ;;  %v1616_v15 = vmax.f32 %v1292_v6, 0.0  ;;  %v1183_v16 = vadd.f32 %v1182_v11, %v2775_v25  ;;  %v1296_v17 = vadd.f32 %v1295_v12, %v2778_v26  ;;  %v1184_v18 = vpop.f32.mrb[31].mxu0  ;;  %v1297_v33 = vpop.f32.mrb[31].mxu1 }
 0x2eb   : > { %v1615_v19 = vmax.f32 %v1181_v9, 0.0  ;;  %v1617_v20 = vmax.f32 %v1294_v10, 0.0  ;;  %v1185_v21 = vadd.f32 %v1184_v18, %v2781_v27  ;;  %v1298_v49 = vadd.f32 %v1297_v33, %v2784_v28 }
 0x2ec   : > { %v1699_v14 = vmax.f32 %v1698_v63, %v1614_v13  ;;  %v1741_v58 = vmax.f32 %v1740_v0, %v1616_v15  ;;  %v1622_v24 = vmax.f32 %v1183_v16, 0.0  ;;  %v1624_v23 = vmax.f32 %v1296_v17, 0.0 }
 0x2ed   : > { %v1720_v29 = vmax.f32 %v1719_v1, %v1615_v19  ;;  %v1762_v30 = vmax.f32 %v1761_v2, %v1617_v20  ;;  %v1623_v31 = vmax.f32 %v1185_v21, 0.0  ;;  %v1625_v34 = vmax.f32 %v1298_v49, 0.0 }
 0x2ee   : > { %v1700_v36 = vmax.f32 %v1699_v14, %v1622_v24  ;;  %v1742_v37 = vmax.f32 %v1741_v58, %v1624_v23 }
 0x2ef   : > { %v1721_v39 = vmax.f32 %v1720_v29, %v1623_v31  ;;  %v1763_v32 = vmax.f32 %v1762_v30, %v1625_v34  ;;  %v1188_v35 = vpop.f32.mrb[32].mxu0  ;;  %v1301_v38 = vpop.f32.mrb[32].mxu1 }
 0x2f0   : > { %v1189_v40 = vadd.f32 %v1188_v35, %v2775_v25  ;;  %v1302_v41 = vadd.f32 %v1301_v38, %v2778_v26  ;;  %v1190_v42 = vpop.f32.mrb[33].mxu0  ;;  %v1303_v43 = vpop.f32.mrb[33].mxu1 }
 0x2f1   : > { %v1191_v44 = vadd.f32 %v1190_v42, %v2781_v27  ;;  %v1304_v45 = vadd.f32 %v1303_v43, %v2784_v28  ;;  %v1192_v46 = vpop.f32.mrb[34].mxu0  ;;  %v1305_v47 = vpop.f32.mrb[34].mxu1 }
 0x2f2   : > { %v1630_v48 = vmax.f32 %v1189_v40, 0.0  ;;  %v1632_v51 = vmax.f32 %v1302_v41, 0.0  ;;  %v1193_v52 = vadd.f32 %v1192_v46, %v2775_v25  ;;  %v1306_v53 = vadd.f32 %v1305_v47, %v2778_v26  ;;  %v1194_v54 = vpop.f32.mrb[35].mxu0  ;;  %v1307_v55 = vpop.f32.mrb[35].mxu1 }
 0x2f3   : > { %v1631_v56 = vmax.f32 %v1191_v44, 0.0  ;;  %v1633_v57 = vmax.f32 %v1304_v45, 0.0  ;;  %v1195_v59 = vadd.f32 %v1194_v54, %v2781_v27  ;;  %v1308_v60 = vadd.f32 %v1307_v55, %v2784_v28 }
 0x2f4   : > { %v1701_v61 = vmax.f32 %v1700_v36, %v1630_v48  ;;  %v1743_v62 = vmax.f32 %v1742_v37, %v1632_v51  ;;  %v1638_v63 = vmax.f32 %v1193_v52, 0.0  ;;  %v1640_v0 = vmax.f32 %v1306_v53, 0.0 }
 0x2f5   : > { %v1722_v1 = vmax.f32 %v1721_v39, %v1631_v56  ;;  %v1764_v2 = vmax.f32 %v1763_v32, %v1633_v57  ;;  %v1639_v3 = vmax.f32 %v1195_v59, 0.0  ;;  %v1641_v4 = vmax.f32 %v1308_v60, 0.0 }
 0x2f6   : > { %v1702_v5 = vmax.f32 %v1701_v61, %v1638_v63  ;;  %v1744_v6 = vmax.f32 %v1743_v62, %v1640_v0  ;;  %v772_v46 = vsub.s32 4, %v2763_v50  ;;  %v780_v53 = vsub.s32 6, %v2763_v50 }
 0x2f7   : > { %v1723_v7 = vmax.f32 %v1722_v1, %v1639_v3  ;;  %v1765_v8 = vmax.f32 %v1764_v2, %v1641_v4  ;;  %v1198_v9 = vpop.f32.mrb[36].mxu0  ;;  %v1311_v10 = vpop.f32.mrb[36].mxu1  ;;  %v776_v54 = vsub.s32 5, %v2763_v50  ;;  %v2447_v60 = vmov 1966171168  }
 0x2f8   : > { %v1199_v11 = vadd.f32 %v1198_v9, %v2775_v25  ;;  %v1312_v12 = vadd.f32 %v1311_v10, %v2778_v26  ;;  %v1200_v13 = vpop.f32.mrb[37].mxu0  ;;  %v1313_v15 = vpop.f32.mrb[37].mxu1  ;;  %v1879_v61 = vunpack.c.l.s4 %v2447_v60  ;;  %v784_v62 = vsub.s32 7, %v2763_v50 }
 0x2f9   : > { %v1201_v16 = vadd.f32 %v1200_v13, %v2781_v27  ;;  %v1314_v17 = vadd.f32 %v1313_v15, %v2784_v28  ;;  %v1202_v18 = vpop.f32.mrb[38].mxu0  ;;  %v1315_v33 = vpop.f32.mrb[38].mxu1 }
 0x2fa   : > { %v1646_v19 = vmax.f32 %v1199_v11, 0.0  ;;  %v1648_v20 = vmax.f32 %v1312_v12, 0.0  ;;  %v1203_v21 = vadd.f32 %v1202_v18, %v2775_v25  ;;  %v1316_v49 = vadd.f32 %v1315_v33, %v2778_v26  ;;  %v1204_v14 = vpop.f32.mrb[39].mxu0  ;;  %v1317_v58 = vpop.f32.mrb[39].mxu1 }
 0x2fb   : > { %v1647_v24 = vmax.f32 %v1201_v16, 0.0  ;;  %v1649_v23 = vmax.f32 %v1314_v17, 0.0  ;;  %v1205_v29 = vadd.f32 %v1204_v14, %v2781_v27  ;;  %v1318_v30 = vadd.f32 %v1317_v58, %v2784_v28 }
 0x2fc   : > { %v1703_v31 = vmax.f32 %v1702_v5, %v1646_v19  ;;  %v1745_v34 = vmax.f32 %v1744_v6, %v1648_v20  ;;  %v1654_v36 = vmax.f32 %v1203_v21, 0.0  ;;  %v1656_v37 = vmax.f32 %v1316_v49, 0.0 }
 0x2fd   : > { %v1724_v39 = vmax.f32 %v1723_v7, %v1647_v24  ;;  %v1766_v32 = vmax.f32 %v1765_v8, %v1649_v23  ;;  %v1655_v35 = vmax.f32 %v1205_v29, 0.0  ;;  %v1657_v38 = vmax.f32 %v1318_v30, 0.0 }
 0x2fe   : > { %v1704_v40 = vmax.f32 %v1703_v31, %v1654_v36  ;;  %v1746_v41 = vmax.f32 %v1745_v34, %v1656_v37  ;;  %v2847_v14 = vrot.slane %v2770_v22, %v772_v46  ;;  %v2852_v30 = vrot.slane %v2770_v22, %v780_v53 }
 0x2ff   : > { %v1725_v42 = vmax.f32 %v1724_v39, %v1655_v35  ;;  %v1767_v43 = vmax.f32 %v1766_v32, %v1657_v38  ;;  %v1208_v44 = vpop.f32.mrb[40].mxu0  ;;  %v1321_v45 = vpop.f32.mrb[40].mxu1  ;;  %v2855_v31 = vrot.slane %v2770_v22, %v776_v54  ;;  %v1880_v32 = vunpack.c.0.s8 %v1879_v61 }
 0x300   : > { %v1209_v47 = vadd.f32 %v1208_v44, %v2775_v25  ;;  %v1322_v48 = vadd.f32 %v1321_v45, %v2778_v26  ;;  %v1210_v51 = vpop.f32.mrb[41].mxu0  ;;  %v1323_v52 = vpop.f32.mrb[41].mxu1  ;;  %v2860_v35 = vrot.slane %v2770_v22, %v784_v62 }
 0x301   : > { %v1211_v55 = vadd.f32 %v1210_v51, %v2781_v27  ;;  %v1324_v56 = vadd.f32 %v1323_v52, %v2784_v28  ;;  %v1212_v57 = vpop.f32.mrb[42].mxu0  ;;  %v1325_v59 = vpop.f32.mrb[42].mxu1 }
 0x302   : > { %v1662_v63 = vmax.f32 %v1209_v47, 0.0  ;;  %v1664_v0 = vmax.f32 %v1322_v48, 0.0  ;;  %v1213_v1 = vadd.f32 %v1212_v57, %v2775_v25  ;;  %v1326_v2 = vadd.f32 %v1325_v59, %v2778_v26  ;;  %v1214_v3 = vpop.f32.mrb[43].mxu0  ;;  %v1327_v4 = vpop.f32.mrb[43].mxu1 }
 0x303   : > { %v1663_v5 = vmax.f32 %v1211_v55, 0.0  ;;  %v1665_v6 = vmax.f32 %v1324_v56, 0.0  ;;  %v1215_v7 = vadd.f32 %v1214_v3, %v2781_v27  ;;  %v1328_v8 = vadd.f32 %v1327_v4, %v2784_v28 }
 0x304   : > { %v1705_v9 = vmax.f32 %v1704_v40, %v1662_v63  ;;  %v1747_v10 = vmax.f32 %v1746_v41, %v1664_v0  ;;  %v1670_v11 = vmax.f32 %v1213_v1, 0.0  ;;  %v1672_v12 = vmax.f32 %v1326_v2, 0.0 }
 0x305   : > { %v1726_v13 = vmax.f32 %v1725_v42, %v1663_v5  ;;  %v1768_v15 = vmax.f32 %v1767_v43, %v1665_v6  ;;  %v1671_v16 = vmax.f32 %v1215_v7, 0.0  ;;  %v1673_v17 = vmax.f32 %v1328_v8, 0.0 }
 0x306   : > { %v1706_v18 = vmax.f32 %v1705_v9, %v1670_v11  ;;  %v1748_v33 = vmax.f32 %v1747_v10, %v1672_v12 }
 0x307   : > { %v1727_v19 = vmax.f32 %v1726_v13, %v1671_v16  ;;  %v1769_v20 = vmax.f32 %v1768_v15, %v1673_v17  ;;  %v1218_v21 = vpop.f32.mrb[44].mxu0  ;;  %v1331_v49 = vpop.f32.mrb[44].mxu1 }
 0x308   : > { %v1219_v58 = vadd.f32 %v1218_v21, %v2775_v25  ;;  %v1332_v24 = vadd.f32 %v1331_v49, %v2778_v26  ;;  %v1220_v23 = vpop.f32.mrb[45].mxu0  ;;  %v1333_v29 = vpop.f32.mrb[45].mxu1 }
 0x309   : > { %v1221_v34 = vadd.f32 %v1220_v23, %v2781_v27  ;;  %v1334_v36 = vadd.f32 %v1333_v29, %v2784_v28  ;;  %v1222_v37 = vpop.f32.mrb[46].mxu0  ;;  %v1335_v39 = vpop.f32.mrb[46].mxu1 }
 0x30a   : > { %v1678_v38 = vmax.f32 %v1219_v58, 0.0  ;;  %v1680_v40 = vmax.f32 %v1332_v24, 0.0  ;;  %v1223_v41 = vadd.f32 %v1222_v37, %v2775_v25  ;;  %v1336_v42 = vadd.f32 %v1335_v39, %v2778_v26  ;;  %v1224_v43 = vpop.f32.mrb[47].mxu0  ;;  %v1337_v44 = vpop.f32.mrb[47].mxu1 }
 0x30b   : > { %v1679_v45 = vmax.f32 %v1221_v34, 0.0  ;;  %v1681_v46 = vmax.f32 %v1334_v36, 0.0  ;;  %v1225_v47 = vadd.f32 %v1224_v43, %v2781_v27  ;;  %v1338_v48 = vadd.f32 %v1337_v44, %v2784_v28 }
 0x30c   : > { %v1707_v51 = vmax.f32 %v1706_v18, %v1678_v38  ;;  %v1749_v52 = vmax.f32 %v1748_v33, %v1680_v40  ;;  %v1686_v53 = vmax.f32 %v1223_v41, 0.0  ;;  %v1688_v54 = vmax.f32 %v1336_v42, 0.0 }
 0x30d   : > { %v1728_v22 = vmax.f32 %v1727_v19, %v1679_v45  ;;  %v1770_v55 = vmax.f32 %v1769_v20, %v1681_v46  ;;  %v1687_v56 = vmax.f32 %v1225_v47, 0.0  ;;  %v1689_v57 = vmax.f32 %v1338_v48, 0.0 }
 0x30e   : > { %v1708_v59 = vmax.f32 %v1707_v51, %v1686_v53  ;;  %v1750_v25 = vmax.f32 %v1749_v52, %v1688_v54  ;;  %v2867_v26 = vsub.s32 %v1880_v32, %v2763_v50 }
 0x30f   : > { %v1729_v60 = vmax.f32 %v1728_v22, %v1687_v56  ;;  %v1771_v61 = vmax.f32 %v1770_v55, %v1689_v57  ;;  %v1374_v62 = vpop.f32.mrb[48].mxu0  ;;  %v1487_v63 = vpop.f32.mrb[48].mxu1 }
 0x310   : > { %v1709_v27 = vrot.slane %v1708_v59, 4  ;;  %v1751_v0 = vrot.slane %v1750_v25, 4  ;;  %v1375_v28 = vadd.f32 %v1374_v62, %v2847_v14  ;;  %v1488_v1 = vadd.f32 %v1487_v63, %v2852_v30  ;;  %v1376_v2 = vpop.f32.mrb[49].mxu0  ;;  %v1489_v3 = vpop.f32.mrb[49].mxu1 }
 0x311   : > { %v1730_v4 = vrot.slane %v1729_v60, 4  ;;  %v1772_v5 = vrot.slane %v1771_v61, 4  ;;  %v1377_v6 = vadd.f32 %v1376_v2, %v2855_v31  ;;  %v1490_v7 = vadd.f32 %v1489_v3, %v2860_v35  ;;  %v1378_v8 = vpop.f32.mrb[50].mxu0  ;;  %v1491_v50 = vpop.f32.mrb[50].mxu1 }
 0x312   : > { %v1710_v9 = vmax.f32 %v1708_v59, %v1709_v27  ;;  %v1752_v10 = vmax.f32 %v1750_v25, %v1751_v0  ;;  %v1570_v11 = vmax.f32 %v1375_v28, 0.0  ;;  %v1572_v12 = vmax.f32 %v1488_v1, 0.0  ;;  %v1380_v13 = vpop.f32.mrb[51].mxu0  ;;  %v1493_v15 = vpop.f32.mrb[51].mxu1 }
 0x313   : > { %v1731_v16 = vmax.f32 %v1729_v60, %v1730_v4  ;;  %v1773_v17 = vmax.f32 %v1771_v61, %v1772_v5  ;;  %v1571_v18 = vmax.f32 %v1377_v6, 0.0  ;;  %v1573_v33 = vmax.f32 %v1490_v7, 0.0 }
 0x314   : > { %v1711_v19 = vrot.slane %v1710_v9, 2  ;;  %v1753_v20 = vrot.slane %v1752_v10, 2  ;;  %v1379_v21 = vadd.f32 %v1378_v8, %v2847_v14  ;;  %v1492_v49 = vadd.f32 %v1491_v50, %v2852_v30 }
 0x315   : > { %v1732_v58 = vrot.slane %v1731_v16, 2  ;;  %v1774_v24 = vrot.slane %v1773_v17, 2  ;;  %v1381_v23 = vadd.f32 %v1380_v13, %v2855_v31  ;;  %v1494_v29 = vadd.f32 %v1493_v15, %v2860_v35 }
 0x316   : > { %v1712_v34 = vmax.f32 %v1710_v9, %v1711_v19  ;;  %v1754_v36 = vmax.f32 %v1752_v10, %v1753_v20  ;;  %v1578_v37 = vmax.f32 %v1379_v21, 0.0  ;;  %v1580_v39 = vmax.f32 %v1492_v49, 0.0 }
 0x317   : > { %v1733_v32 = vmax.f32 %v1731_v16, %v1732_v58  ;;  %v1775_v38 = vmax.f32 %v1773_v17, %v1774_v24  ;;  %v1579_v40 = vmax.f32 %v1381_v23, 0.0  ;;  %v1581_v41 = vmax.f32 %v1494_v29, 0.0  ;;  %v1384_v42 = vpop.f32.mrb[52].mxu0  ;;  %v1497_v43 = vpop.f32.mrb[52].mxu1 }
 0x318   : > { %v1713_v44 = vrot.slane %v1712_v34, 1  ;;  %v1755_v45 = vrot.slane %v1754_v36, 1  ;;  %v1778_v46 = vmax.f32 %v1570_v11, %v1578_v37  ;;  %v1820_v47 = vmax.f32 %v1572_v12, %v1580_v39  ;;  %v1386_v48 = vpop.f32.mrb[53].mxu0  ;;  %v1499_v51 = vpop.f32.mrb[53].mxu1 }
 0x319   : > { %v1734_v52 = vrot.slane %v1733_v32, 1  ;;  %v1776_v53 = vrot.slane %v1775_v38, 1  ;;  %v1799_v54 = vmax.f32 %v1571_v18, %v1579_v40  ;;  %v1841_v22 = vmax.f32 %v1573_v33, %v1581_v41  ;;  %v1388_v55 = vpop.f32.mrb[54].mxu0  ;;  %v1501_v56 = vpop.f32.mrb[54].mxu1 }
 0x31a   : > { %v1714_v57 = vmax.f32 %v1712_v34, %v1713_v44  ;;  %v1756_v59 = vmax.f32 %v1754_v36, %v1755_v45  ;;  %v1385_v25 = vadd.f32 %v1384_v42, %v2847_v14  ;;  %v1498_v60 = vadd.f32 %v1497_v43, %v2852_v30  ;;  %v1390_v61 = vpop.f32.mrb[55].mxu0  ;;  %v1503_v62 = vpop.f32.mrb[55].mxu1 }
 0x31b   : > { %v1735_v63 = vmax.f32 %v1733_v32, %v1734_v52  ;;  %v1777_v27 = vmax.f32 %v1775_v38, %v1776_v53  ;;  %v1387_v0 = vadd.f32 %v1386_v48, %v2855_v31  ;;  %v1500_v28 = vadd.f32 %v1499_v51, %v2860_v35 }
 0x31c   : > { %v1586_v1 = vmax.f32 %v1385_v25, 0.0  ;;  %v1588_v2 = vmax.f32 %v1498_v60, 0.0  ;;  %v1389_v3 = vadd.f32 %v1388_v55, %v2847_v14  ;;  %v1502_v4 = vadd.f32 %v1501_v56, %v2852_v30 }
 0x31d   : > { %v1874_v5 = vcombine.low %v1714_v57, %v1735_v63  ;;  %v1875_v6 = vcombine.low %v1756_v59, %v1777_v27  ;;  %v1587_v7 = vmax.f32 %v1387_v0, 0.0  ;;  %v1589_v8 = vmax.f32 %v1500_v28, 0.0 }
 0x31e   : > { %v1779_v50 = vmax.f32 %v1778_v46, %v1586_v1  ;;  %v1821_v9 = vmax.f32 %v1820_v47, %v1588_v2  ;;  %v1594_v10 = vmax.f32 %v1389_v3, 0.0  ;;  %v1596_v11 = vmax.f32 %v1502_v4, 0.0 }
 0x31f   : > { %v2884_v12 = vrot.slane %v1874_v5, %v2867_v26  ;;  %v2887_v13 = vrot.slane %v1875_v6, %v2867_v26  ;;  %v1800_v15 = vmax.f32 %v1799_v54, %v1587_v7  ;;  %v1842_v16 = vmax.f32 %v1841_v22, %v1589_v8  ;;  %v1394_v17 = vpop.f32.mrb[56].mxu0  ;;  %v1507_v18 = vpop.f32.mrb[56].mxu1 }
 0x320   : > { %v1780_v33 = vmax.f32 %v1779_v50, %v1594_v10  ;;  %v1822_v19 = vmax.f32 %v1821_v9, %v1596_v11  ;;  %v1391_v20 = vadd.f32 %v1390_v61, %v2855_v31  ;;  %v1504_v21 = vadd.f32 %v1503_v62, %v2860_v35  ;;  %v1396_v49 = vpop.f32.mrb[57].mxu0  ;;  %v1509_v58 = vpop.f32.mrb[57].mxu1 }
 0x321   : > { %v1395_v24 = vadd.f32 %v1394_v17, %v2847_v14  ;;  %v1508_v23 = vadd.f32 %v1507_v18, %v2852_v30  ;;  %v1397_v29 = vadd.f32 %v1396_v49, %v2855_v31  ;;  %v1510_v34 = vadd.f32 %v1509_v58, %v2860_v35  ;;  %v1398_v36 = vpop.f32.mrb[58].mxu0  ;;  %v1511_v37 = vpop.f32.mrb[58].mxu1 }
 0x322   : > { %v1595_v39 = vmax.f32 %v1391_v20, 0.0  ;;  %v1597_v32 = vmax.f32 %v1504_v21, 0.0  ;;  %v1399_v38 = vadd.f32 %v1398_v36, %v2847_v14  ;;  %v1512_v40 = vadd.f32 %v1511_v37, %v2852_v30  ;;  %v1400_v41 = vpop.f32.mrb[59].mxu0  ;;  %v1513_v42 = vpop.f32.mrb[59].mxu1 }
 0x323   : > { %v1602_v43 = vmax.f32 %v1395_v24, 0.0  ;;  %v1604_v44 = vmax.f32 %v1508_v23, 0.0  ;;  %v1603_v45 = vmax.f32 %v1397_v29, 0.0  ;;  %v1605_v46 = vmax.f32 %v1510_v34, 0.0 }
 0x324   : > { %v1801_v47 = vmax.f32 %v1800_v15, %v1595_v39  ;;  %v1843_v48 = vmax.f32 %v1842_v16, %v1597_v32  ;;  %v1610_v51 = vmax.f32 %v1399_v38, 0.0  ;;  %v1612_v52 = vmax.f32 %v1512_v40, 0.0 }
 0x325   : > { %v1781_v53 = vmax.f32 %v1780_v33, %v1602_v43  ;;  %v1823_v54 = vmax.f32 %v1822_v19, %v1604_v44  ;;  %v1401_v22 = vadd.f32 %v1400_v41, %v2855_v31  ;;  %v1514_v55 = vadd.f32 %v1513_v42, %v2860_v35 }
 0x326   : > { %v1802_v56 = vmax.f32 %v1801_v47, %v1603_v45  ;;  %v1844_v57 = vmax.f32 %v1843_v48, %v1605_v46  ;;  %v1906_v59 = vcombine.low %v2884_v12, %v2887_v13 }
 0x327   : > { %v1782_v25 = vmax.f32 %v1781_v53, %v1610_v51  ;;  %v1824_v60 = vmax.f32 %v1823_v54, %v1612_v52  ;;  %v1611_v61 = vmax.f32 %v1401_v22, 0.0  ;;  %v1613_v62 = vmax.f32 %v1514_v55, 0.0  ;;  %v1404_v63 = vpop.f32.mrb[60].mxu0  ;;  %v1517_v27 = vpop.f32.mrb[60].mxu1 }
 0x328   : > { %v1405_v0 = vadd.f32 %v1404_v63, %v2847_v14  ;;  %v1518_v28 = vadd.f32 %v1517_v27, %v2852_v30  ;;  %v1406_v1 = vpop.f32.mrb[61].mxu0  ;;  %v1519_v2 = vpop.f32.mrb[61].mxu1 }
 0x329   : > { %v1803_v3 = vmax.f32 %v1802_v56, %v1611_v61  ;;  %v1845_v4 = vmax.f32 %v1844_v57, %v1613_v62  ;;  %v1407_v5 = vadd.f32 %v1406_v1, %v2855_v31  ;;  %v1520_v6 = vadd.f32 %v1519_v2, %v2860_v35  ;;  %v1408_v7 = vpop.f32.mrb[62].mxu0  ;;  %v1521_v8 = vpop.f32.mrb[62].mxu1 }
 0x32a   : > { %v1618_v50 = vmax.f32 %v1405_v0, 0.0  ;;  %v1620_v9 = vmax.f32 %v1518_v28, 0.0  ;;  %v1409_v10 = vadd.f32 %v1408_v7, %v2847_v14  ;;  %v1522_v11 = vadd.f32 %v1521_v8, %v2852_v30  ;;  %v1410_v15 = vpop.f32.mrb[63].mxu0  ;;  %v1523_v16 = vpop.f32.mrb[63].mxu1 }
 0x32b   : > { %v1619_v17 = vmax.f32 %v1407_v5, 0.0  ;;  %v1621_v18 = vmax.f32 %v1520_v6, 0.0  ;;  %v1411_v33 = vadd.f32 %v1410_v15, %v2855_v31  ;;  %v1524_v19 = vadd.f32 %v1523_v16, %v2860_v35 }
 0x32c   : > { %v1783_v20 = vmax.f32 %v1782_v25, %v1618_v50  ;;  %v1825_v21 = vmax.f32 %v1824_v60, %v1620_v9  ;;  %v1626_v49 = vmax.f32 %v1409_v10, 0.0  ;;  %v1628_v58 = vmax.f32 %v1522_v11, 0.0 }
 0x32d   : > { %v1804_v24 = vmax.f32 %v1803_v3, %v1619_v17  ;;  %v1846_v23 = vmax.f32 %v1845_v4, %v1621_v18  ;;  %v1627_v29 = vmax.f32 %v1411_v33, 0.0  ;;  %v1629_v34 = vmax.f32 %v1524_v19, 0.0 }
 0x32e   : > { %v1784_v36 = vmax.f32 %v1783_v20, %v1626_v49  ;;  %v1826_v37 = vmax.f32 %v1825_v21, %v1628_v58 }
 0x32f   : > { %v1805_v39 = vmax.f32 %v1804_v24, %v1627_v29  ;;  %v1847_v32 = vmax.f32 %v1846_v23, %v1629_v34  ;;  %v1414_v38 = vpop.f32.mrb[64].mxu0  ;;  %v1527_v40 = vpop.f32.mrb[64].mxu1 }
 0x330   : > { %v1415_v41 = vadd.f32 %v1414_v38, %v2847_v14  ;;  %v1528_v42 = vadd.f32 %v1527_v40, %v2852_v30  ;;  %v1416_v43 = vpop.f32.mrb[65].mxu0  ;;  %v1529_v44 = vpop.f32.mrb[65].mxu1 }
 0x331   : > { %v1417_v45 = vadd.f32 %v1416_v43, %v2855_v31  ;;  %v1530_v46 = vadd.f32 %v1529_v44, %v2860_v35  ;;  %v1418_v47 = vpop.f32.mrb[66].mxu0  ;;  %v1531_v48 = vpop.f32.mrb[66].mxu1 }
 0x332   : > { %v1634_v51 = vmax.f32 %v1415_v41, 0.0  ;;  %v1636_v52 = vmax.f32 %v1528_v42, 0.0  ;;  %v1419_v53 = vadd.f32 %v1418_v47, %v2847_v14  ;;  %v1532_v54 = vadd.f32 %v1531_v48, %v2852_v30  ;;  %v1420_v22 = vpop.f32.mrb[67].mxu0  ;;  %v1533_v55 = vpop.f32.mrb[67].mxu1 }
 0x333   : > { %v1635_v56 = vmax.f32 %v1417_v45, 0.0  ;;  %v1637_v57 = vmax.f32 %v1530_v46, 0.0  ;;  %v1421_v25 = vadd.f32 %v1420_v22, %v2855_v31  ;;  %v1534_v60 = vadd.f32 %v1533_v55, %v2860_v35 }
 0x334   : > { %v1785_v61 = vmax.f32 %v1784_v36, %v1634_v51  ;;  %v1827_v62 = vmax.f32 %v1826_v37, %v1636_v52  ;;  %v1642_v63 = vmax.f32 %v1419_v53, 0.0  ;;  %v1644_v27 = vmax.f32 %v1532_v54, 0.0 }
 0x335   : > { %v1806_v0 = vmax.f32 %v1805_v39, %v1635_v56  ;;  %v1848_v28 = vmax.f32 %v1847_v32, %v1637_v57  ;;  %v1643_v1 = vmax.f32 %v1421_v25, 0.0  ;;  %v1645_v2 = vmax.f32 %v1534_v60, 0.0 }
 0x336   : > { %v1786_v3 = vmax.f32 %v1785_v61, %v1642_v63  ;;  %v1828_v4 = vmax.f32 %v1827_v62, %v1644_v27 }
 0x337   : > { %v1807_v5 = vmax.f32 %v1806_v0, %v1643_v1  ;;  %v1849_v6 = vmax.f32 %v1848_v28, %v1645_v2  ;;  %v1424_v7 = vpop.f32.mrb[68].mxu0  ;;  %v1537_v8 = vpop.f32.mrb[68].mxu1 }
 0x338   : > { %v1425_v50 = vadd.f32 %v1424_v7, %v2847_v14  ;;  %v1538_v9 = vadd.f32 %v1537_v8, %v2852_v30  ;;  %v1426_v10 = vpop.f32.mrb[69].mxu0  ;;  %v1539_v11 = vpop.f32.mrb[69].mxu1 }
 0x339   : > { %v1427_v15 = vadd.f32 %v1426_v10, %v2855_v31  ;;  %v1540_v16 = vadd.f32 %v1539_v11, %v2860_v35  ;;  %v1428_v17 = vpop.f32.mrb[70].mxu0  ;;  %v1541_v18 = vpop.f32.mrb[70].mxu1 }
 0x33a   : > { %v1650_v33 = vmax.f32 %v1425_v50, 0.0  ;;  %v1652_v19 = vmax.f32 %v1538_v9, 0.0  ;;  %v1429_v20 = vadd.f32 %v1428_v17, %v2847_v14  ;;  %v1542_v21 = vadd.f32 %v1541_v18, %v2852_v30  ;;  %v1430_v49 = vpop.f32.mrb[71].mxu0  ;;  %v1543_v58 = vpop.f32.mrb[71].mxu1 }
 0x33b   : > { %v1651_v24 = vmax.f32 %v1427_v15, 0.0  ;;  %v1653_v23 = vmax.f32 %v1540_v16, 0.0  ;;  %v1431_v29 = vadd.f32 %v1430_v49, %v2855_v31  ;;  %v1544_v34 = vadd.f32 %v1543_v58, %v2860_v35 }
 0x33c   : > { %v1787_v36 = vmax.f32 %v1786_v3, %v1650_v33  ;;  %v1829_v37 = vmax.f32 %v1828_v4, %v1652_v19  ;;  %v1658_v39 = vmax.f32 %v1429_v20, 0.0  ;;  %v1660_v32 = vmax.f32 %v1542_v21, 0.0 }
 0x33d   : > { %v1808_v38 = vmax.f32 %v1807_v5, %v1651_v24  ;;  %v1850_v40 = vmax.f32 %v1849_v6, %v1653_v23  ;;  %v1659_v41 = vmax.f32 %v1431_v29, 0.0  ;;  %v1661_v42 = vmax.f32 %v1544_v34, 0.0 }
 0x33e   : > { %v1788_v43 = vmax.f32 %v1787_v36, %v1658_v39  ;;  %v1830_v44 = vmax.f32 %v1829_v37, %v1660_v32 }
 0x33f   : > { %v1809_v45 = vmax.f32 %v1808_v38, %v1659_v41  ;;  %v1851_v46 = vmax.f32 %v1850_v40, %v1661_v42  ;;  %v1434_v47 = vpop.f32.mrb[72].mxu0  ;;  %v1547_v48 = vpop.f32.mrb[72].mxu1 }
 0x340   : > { %v1435_v51 = vadd.f32 %v1434_v47, %v2847_v14  ;;  %v1548_v52 = vadd.f32 %v1547_v48, %v2852_v30  ;;  %v1436_v53 = vpop.f32.mrb[73].mxu0  ;;  %v1549_v54 = vpop.f32.mrb[73].mxu1 }
 0x341   : > { %v1437_v22 = vadd.f32 %v1436_v53, %v2855_v31  ;;  %v1550_v55 = vadd.f32 %v1549_v54, %v2860_v35  ;;  %v1438_v56 = vpop.f32.mrb[74].mxu0  ;;  %v1551_v57 = vpop.f32.mrb[74].mxu1 }
 0x342   : > { %v1666_v25 = vmax.f32 %v1435_v51, 0.0  ;;  %v1668_v60 = vmax.f32 %v1548_v52, 0.0  ;;  %v1439_v61 = vadd.f32 %v1438_v56, %v2847_v14  ;;  %v1552_v62 = vadd.f32 %v1551_v57, %v2852_v30  ;;  %v1440_v63 = vpop.f32.mrb[75].mxu0  ;;  %v1553_v27 = vpop.f32.mrb[75].mxu1 }
 0x343   : > { %v1667_v0 = vmax.f32 %v1437_v22, 0.0  ;;  %v1669_v28 = vmax.f32 %v1550_v55, 0.0  ;;  %v1441_v1 = vadd.f32 %v1440_v63, %v2855_v31  ;;  %v1554_v2 = vadd.f32 %v1553_v27, %v2860_v35 }
 0x344   : > { %v1789_v3 = vmax.f32 %v1788_v43, %v1666_v25  ;;  %v1831_v4 = vmax.f32 %v1830_v44, %v1668_v60  ;;  %v1674_v5 = vmax.f32 %v1439_v61, 0.0  ;;  %v1676_v6 = vmax.f32 %v1552_v62, 0.0 }
 0x345   : > { %v1810_v7 = vmax.f32 %v1809_v45, %v1667_v0  ;;  %v1852_v8 = vmax.f32 %v1851_v46, %v1669_v28  ;;  %v1675_v50 = vmax.f32 %v1441_v1, 0.0  ;;  %v1677_v9 = vmax.f32 %v1554_v2, 0.0 }
 0x346   : > { %v1790_v10 = vmax.f32 %v1789_v3, %v1674_v5  ;;  %v1832_v11 = vmax.f32 %v1831_v4, %v1676_v6 }
 0x347   : > { %v1811_v15 = vmax.f32 %v1810_v7, %v1675_v50  ;;  %v1853_v16 = vmax.f32 %v1852_v8, %v1677_v9  ;;  %v1444_v17 = vpop.f32.mrb[76].mxu0  ;;  %v1557_v18 = vpop.f32.mrb[76].mxu1 }
 0x348   : > { %v1445_v33 = vadd.f32 %v1444_v17, %v2847_v14  ;;  %v1558_v19 = vadd.f32 %v1557_v18, %v2852_v30  ;;  %v1446_v20 = vpop.f32.mrb[77].mxu0  ;;  %v1559_v21 = vpop.f32.mrb[77].mxu1  ;;  %v1914_v18 = vrot.slane %v1906_v59, %v2867_v26 }
 0x349   : > { %v1447_v49 = vadd.f32 %v1446_v20, %v2855_v31  ;;  %v1560_v58 = vadd.f32 %v1559_v21, %v2860_v35  ;;  %v1448_v24 = vpop.f32.mrb[78].mxu0  ;;  %v1561_v23 = vpop.f32.mrb[78].mxu1 }
 0x34a   : > { %v1682_v29 = vmax.f32 %v1445_v33, 0.0  ;;  %v1684_v34 = vmax.f32 %v1558_v19, 0.0  ;;  %v1449_v36 = vadd.f32 %v1448_v24, %v2847_v14  ;;  %v1562_v37 = vadd.f32 %v1561_v23, %v2852_v30  ;;  %v1450_v39 = vpop.f32.mrb[79].mxu0  ;;  %v1563_v32 = vpop.f32.mrb[79].mxu1 }
 0x34b   : > { %v1683_v38 = vmax.f32 %v1447_v49, 0.0  ;;  %v1685_v40 = vmax.f32 %v1560_v58, 0.0  ;;  %v1451_v41 = vadd.f32 %v1450_v39, %v2855_v31  ;;  %v1564_v42 = vadd.f32 %v1563_v32, %v2860_v35 }
 0x34c   : > { %v1791_v43 = vmax.f32 %v1790_v10, %v1682_v29  ;;  %v1833_v44 = vmax.f32 %v1832_v11, %v1684_v34  ;;  %v1690_v45 = vmax.f32 %v1449_v36, 0.0  ;;  %v1692_v46 = vmax.f32 %v1562_v37, 0.0 }
 0x34d   : > { %v1812_v47 = vmax.f32 %v1811_v15, %v1683_v38  ;;  %v1854_v48 = vmax.f32 %v1853_v16, %v1685_v40  ;;  %v1691_v51 = vmax.f32 %v1451_v41, 0.0  ;;  %v1693_v52 = vmax.f32 %v1564_v42, 0.0 }
 0x34e   : > { %v1792_v53 = vmax.f32 %v1791_v43, %v1690_v45  ;;  %v1834_v14 = vmax.f32 %v1833_v44, %v1692_v46 }
 0x34f   : > { %v1813_v54 = vmax.f32 %v1812_v47, %v1691_v51  ;;  %v1855_v30 = vmax.f32 %v1854_v48, %v1693_v52 }
 0x350   : > { %v1793_v22 = vrot.slane %v1792_v53, 4  ;;  %v1835_v55 = vrot.slane %v1834_v14, 4 }
 0x351   : > { %v1814_v56 = vrot.slane %v1813_v54, 4  ;;  %v1856_v57 = vrot.slane %v1855_v30, 4 }
 0x352   : > { %v1794_v25 = vmax.f32 %v1792_v53, %v1793_v22  ;;  %v1836_v31 = vmax.f32 %v1834_v14, %v1835_v55 }
 0x353   : > { %v1815_v35 = vmax.f32 %v1813_v54, %v1814_v56  ;;  %v1857_v60 = vmax.f32 %v1855_v30, %v1856_v57 }
 0x354   : > { %v1795_v61 = vrot.slane %v1794_v25, 2  ;;  %v1837_v62 = vrot.slane %v1836_v31, 2 }
 0x355   : > { %v1816_v63 = vrot.slane %v1815_v35, 2  ;;  %v1858_v27 = vrot.slane %v1857_v60, 2 }
 0x356   : > { %v1796_v0 = vmax.f32 %v1794_v25, %v1795_v61  ;;  %v1838_v28 = vmax.f32 %v1836_v31, %v1837_v62 }
 0x357   : > { %v1817_v1 = vmax.f32 %v1815_v35, %v1816_v63  ;;  %v1859_v2 = vmax.f32 %v1857_v60, %v1858_v27 }
 0x358   : > { %v1797_v3 = vrot.slane %v1796_v0, 1  ;;  %v1839_v4 = vrot.slane %v1838_v28, 1 }
 0x359   : > { %v1818_v5 = vrot.slane %v1817_v1, 1  ;;  %v1860_v6 = vrot.slane %v1859_v2, 1 }
 0x35a   : > { %v1798_v7 = vmax.f32 %v1796_v0, %v1797_v3  ;;  %v1840_v8 = vmax.f32 %v1838_v28, %v1839_v4 }
 0x35b   : > { %v1819_v50 = vmax.f32 %v1817_v1, %v1818_v5  ;;  %v1861_v9 = vmax.f32 %v1859_v2, %v1860_v6 }
 0x35d   : > { %v1876_v10 = vcombine.low %v1798_v7, %v1819_v50  ;;  %v1877_v11 = vcombine.low %v1840_v8, %v1861_v9 }
 0x35f   : > { %v1898_v15 = vrot.slane %v1876_v10, %v2867_v26  ;;  %v1905_v16 = vrot.slane %v1877_v11, %v2867_v26 }
 0x361   : > { %v1907_v17 = vcombine.low %v1898_v15, %v1905_v16 }
 0x363   : > { %v1921_v33 = vrot.slane %v1907_v17, %v2867_v26 }
 0x365   : > { %v1922_v19 = vcombine.low %v1914_v18, %v1921_v33 }
 0x367   : > { %1924 = vst [vmem:[%s309_s21] sm:$0xff] %v1922_v19 }
 0x368   : > { %2372 = shalt.err (!%p2369_p6)
}
 0x369   : > { %s2373_s16 = scalar_lea.hbm %s2953_s19, 128  ;;  %s2377_s20 = scalar_lea.hbm %s3007_s7, 256 }
 0x36a   : > { %p2374_p7 = scmp.ne.s32.totalorder %s2953_s19, %s2373_s16  ;;  %p2378_p0 = scmp.lt.u32.totalorder %s2953_s19, %s3007_s7 }
 0x36b   : > { %p2379_p2 = scmp.lt.u32.totalorder %s2377_s20, %s2373_s16  ;;  %p2381_p8 = scmp.lt.u32.totalorder %s2373_s16, %s2953_s19 }
 0x36c   : > { %p2375_p9 = pnand %p2374_p7, %p3019_p10 }
 0x36d   : > { %p2380_p4 = por %p2379_p2, %p2378_p0 }
 0x36e   : > { %p2376_p12 = pneg %p2375_p9 }
 0x36f   : > { %p2382_p11 = por %p2381_p8, %p2380_p4 }
 0x371   : > { %p2383_p13 = pnand %p2382_p11, %p2376_p12 }
 0x373   : > { %2386 = shalt.err (!%p2383_p13)
}
 0x374   : > { %2261 = dma.vmem_to_hbm [thread:$0]  (%p3019_p10), %s2955_s23, 128, %s2953_s19, %s1991_s27  }
 0x375 PF: > { %p2273_p1 = scmp.ge.s32.totalorder %s2441_s29, 2  ;;  %s2017_s30 = sand.u32 1, %s2421_s24  }
 0x376   : > { %p3020_p3 = scmp.ne.s32.totalorder %s3013_s13, 0  ;;  %s2018_s8 = scalar_lea.sflag [#allocation4], %s2017_s30 }
 0x378   : > { %p2268_p5 = pnand %p2273_p1, %p3020_p3 }
 0x37a   : > { %2416 = dma.done.wait (!%p2268_p5), %s2018_s8, 128  }
 0x37b   : > { %2418 = vsyncadd (!%p2268_p5), %s2018_s8, 4294967168  ;;  %s21_s29 = sadd.s32 1, %s2441_s29   ;;  %s3021_s24 = smov %s2425_s25 }
 0x37c   : > { %p18_p6 = scmp.ge.s32.totalorder %s21_s29, 4   ;;  %s3022_s25 = smov %s2429_s26 }
 0x37d   : > { %s3023_s26 = smov %s2542_s14  ;;  %s3024_s27 = smov %s2437_s28 }
 0x37e   : > { %s3025_s28 = smov %s3027_s9  ;;  %20 = sbr.rel (!%p18_p6) target bundleno = 5 (0x5), region = 96 }
 0x385   :  { %2023 = vsyncpa [#allocation3], 1 }
 0x386   :  { %2025 = vsyncpa [#allocation3 + $0x1], 1 }
 0x387   :  { %2026 = vsyncpa [#allocation4], 1 }
 0x388   :  { %2028 = vsyncpa [#allocation4 + $0x1], 1 }

</bundles_post_ra>
